<compile_context>
chip_gen: v6e
topology: v6e:2x2x1
jax: 0.10.0
libtpu: 0.0.40
codegen_flags: <defaults>
</compile_context>

<pallas_src>
import functools
import math

import jax
import jax.numpy as jnp
from jax.experimental import pallas as pl
from jax.experimental.pallas import tpu as pltpu


def _layer_norm(x, gamma, beta, eps=1e-5):
    mu = jnp.mean(x, axis=-1, keepdims=True)
    var = jnp.mean(jnp.square(x - mu), axis=-1, keepdims=True)
    return (x - mu) * jax.lax.rsqrt(var + eps) * gamma + beta


def _transformer_layer_kernel(
    x_ref, bias_ref,
    wqkv_ref, bqkv_ref, wo_ref, bo_ref,
    g1_ref, be1_ref, g2_ref, be2_ref,
    w1_ref, b1_ref, w2_ref, b2_ref,
    o_ref,
    *, after_norm: bool,
):
    B, L, D = x_ref.shape
    N = B * L
    bf16 = jnp.bfloat16

    x = x_ref[...]                      # (B, L, D) f32
    x2 = x.reshape(N, D)                # flatten tokens onto the sublane axis

    xn = x2 if after_norm else _layer_norm(x2, g1_ref[...], be1_ref[...])

    # ---- fused QKV projection: one (N, D) x (D, 3D) MXU pass; scale folded into Wq ----
    qkv = jnp.dot(xn.astype(bf16), wqkv_ref[...],
                  preferred_element_type=jnp.float32) + bqkv_ref[...]
    q = qkv[:, 0:D].reshape(B, L, D)            # already scaled by 1/sqrt(D)
    k = qkv[:, D:2 * D].reshape(B, L, D)
    v = qkv[:, 2 * D:3 * D].reshape(B, L, D)

    # ---- attention scores + masked softmax (additive key-mask bias) ----
    scores = jnp.einsum('bqd,bkd->bqk', q.astype(bf16), k.astype(bf16),
                        preferred_element_type=jnp.float32)
    scores = scores + bias_ref[...][:, None, :]        # (B,1,L) broadcast over queries

    m = jnp.max(scores, axis=-1, keepdims=True)
    p = jnp.exp(scores - m)
    attn = p * pl.reciprocal(jnp.sum(p, axis=-1, keepdims=True), approx=True)

    ctx = jnp.einsum('bqk,bkd->bqd', attn.astype(bf16), v.astype(bf16),
                     preferred_element_type=jnp.float32)

    # ---- output projection on the flattened view ----
    attn_out = jnp.dot(ctx.reshape(N, D).astype(bf16), wo_ref[...],
                       preferred_element_type=jnp.float32) + bo_ref[...]

    # ---- x = x.transpose(0, 1); x = x + residual  (requires B == L) ----
    y = jnp.swapaxes(attn_out.reshape(B, L, D), 0, 1) + x
    y = y.reshape(N, D)
    if after_norm:
        y = _layer_norm(y, g1_ref[...], be1_ref[...])

    # ---- FFN (dropout == identity in eval mode) ----
    residual = y
    h_in = y if after_norm else _layer_norm(y, g2_ref[...], be2_ref[...])
    h = jnp.dot(h_in.astype(bf16), w1_ref[...],
                preferred_element_type=jnp.float32) + b1_ref[...]
    h = jnp.maximum(h, 0.0)
    ff = jnp.dot(h.astype(bf16), w2_ref[...],
                 preferred_element_type=jnp.float32) + b2_ref[...]
    out = residual + ff
    if after_norm:
        out = _layer_norm(out, g2_ref[...], be2_ref[...])

    o_ref[...] = out.astype(o_ref.dtype)        # (B*L, D) lane-dense store


def transformer_layer(x, mask, params, *, after_norm=True):
    """x: (B, L, D) f32, mask: (B, L) with 0 == pad. Returns (B, L, D)."""
    B, L, D = x.shape
    # The reference forward's x.transpose(0,1) + residual only type-checks when B == L.
    assert B == L, "TransformerLayer reference semantics require batch == seq_len"

    inv_sqrt_d = 1.0 / math.sqrt(D)
    # Fused QKV weight/bias, with the 1/sqrt(D) score scale folded into the Q columns.
    wqkv = jnp.concatenate(
        [params['wq'] * inv_sqrt_d, params['wk'], params['wv']], axis=1
    ).astype(jnp.bfloat16)
    bqkv = jnp.concatenate(
        [params['bq'] * inv_sqrt_d, params['bk'], params['bv']], axis=1)
    # Additive key mask: 0 for valid keys, -1e30 for pad keys.
    # (Fully-masked rows degrade to a uniform distribution over pad keys, as in the
    #  original jnp.where formulation; query pad rows are not masked, matching PyTorch.)
    mask_bias = (mask.astype(jnp.float32) - 1.0) * 1e30

    flat = [
        wqkv, bqkv,
        params['wo'].astype(jnp.bfloat16), params['bo'],
        params['g1'], params['be1'], params['g2'], params['be2'],
        params['w1'].astype(jnp.bfloat16), params['b1'],
        params['w2'].astype(jnp.bfloat16), params['b2'],
    ]
    n_in = 2 + len(flat)
    kernel = functools.partial(_transformer_layer_kernel, after_norm=after_norm)
    out2d = pl.pallas_call(
        kernel,
        out_shape=jax.ShapeDtypeStruct((B * L, D), x.dtype),
        in_specs=[pl.BlockSpec(memory_space=pltpu.MemorySpace.VMEM)] * n_in,
        out_specs=pl.BlockSpec(memory_space=pltpu.MemorySpace.VMEM),
    )(x, mask_bias, *flat)
    return out2d.reshape(B, L, D)


def transformer_layer_ref(x, mask, params, *, after_norm=True):
    """Pure-JAX f32 reference of the same forward (for correctness checking)."""
    D = x.shape[-1]

    def ln(v, g, b, eps=1e-5):
        mu = v.mean(-1, keepdims=True)
        var = ((v - mu) ** 2).mean(-1, keepdims=True)
        return (v - mu) / jnp.sqrt(var + eps) * g + b

    residual = x
    h = x if after_norm else ln(x, params['g1'], params['be1'])
    q = h @ params['wq'] + params['bq']
    k = h @ params['wk'] + params['bk']
    v = h @ params['wv'] + params['bv']
    scores = jnp.einsum('bqd,bkd->bqk', q, k) / math.sqrt(D)
    scores = jnp.where(mask[:, None, :] > 0, scores, -1e30)
    attn = jax.nn.softmax(scores, axis=-1)
    ctx = jnp.einsum('bqk,bkd->bqd', attn, v)
    a = ctx @ params['wo'] + params['bo']
    xx = jnp.swapaxes(a, 0, 1) + residual
    if after_norm:
        xx = ln(xx, params['g1'], params['be1'])
    residual = xx
    h2 = xx if after_norm else ln(xx, params['g2'], params['be2'])
    h2 = jnp.maximum(h2 @ params['w1'] + params['b1'], 0.0)
    y = h2 @ params['w2'] + params['b2']
    xx = residual + y
    if after_norm:
        xx = ln(xx, params['g2'], params['be2'])
    return xx


def init_params(key, d_model, feedforward_dim):
    ks = jax.random.split(key, 6)
    s = 0.02
    return {
        'wq': s * jax.random.normal(ks[0], (d_model, d_model), jnp.float32),
        'wk': s * jax.random.normal(ks[1], (d_model, d_model), jnp.float32),
        'wv': s * jax.random.normal(ks[2], (d_model, d_model), jnp.float32),
        'wo': s * jax.random.normal(ks[3], (d_model, d_model), jnp.float32),
        'bq': jnp.zeros((1, d_model), jnp.float32),
        'bk': jnp.zeros((1, d_model), jnp.float32),
        'bv': jnp.zeros((1, d_model), jnp.float32),
        'bo': jnp.zeros((1, d_model), jnp.float32),
        'g1': jnp.ones((1, d_model), jnp.float32),
        'be1': jnp.zeros((1, d_model), jnp.float32),
        'g2': jnp.ones((1, d_model), jnp.float32),
        'be2': jnp.zeros((1, d_model), jnp.float32),
        'w1': s * jax.random.normal(ks[4], (d_model, feedforward_dim), jnp.float32),
        'b1': jnp.zeros((1, feedforward_dim), jnp.float32),
        'w2': s * jax.random.normal(ks[5], (feedforward_dim, d_model), jnp.float32),
        'b2': jnp.zeros((1, d_model), jnp.float32),
    }


if __name__ == "__main__":
    # B == L required by the reference's transpose(0,1)+residual; D=128 keeps every
    # matmul/store lane-dense (128-lane multiple) per the performance review.
    B, L, D, FF = 8, 8, 128, 256
    key = jax.random.PRNGKey(0)
    kx, kp = jax.random.split(key)

    x = jax.random.normal(kx, (B, L, D), jnp.float32)
    lengths = jnp.array([8, 7, 6, 5, 8, 4, 3, 8], jnp.int32)   # varying valid lengths
    mask = (jnp.arange(L)[None, :] < lengths[:, None]).astype(jnp.float32)

    params = init_params(kp, D, FF)

    out = transformer_layer(x, mask, params, after_norm=True)
    out = jax.block_until_ready(out)
    assert out.shape == (B, L, D)
    assert bool(jnp.all(jnp.isfinite(out)))

    # Compare against the pure-f32 reference (kernel uses bf16 MXU operands + approx
    # reciprocal, so use a loose tolerance).
    ref = transformer_layer_ref(x, mask, params, after_norm=True)
    max_err = float(jnp.max(jnp.abs(out - ref)))
    assert max_err < 0.08, f"kernel vs reference max abs err = {max_err}"

    # TODO(synk): dropout layers are treated as identity (eval mode); no in-kernel RNG dropout.
    print("KERNEL_OK")
</pallas_src>

<mosaic_0001>
module attributes {stable_mosaic.version = 11 : i64} {
  func.func @_transformer_layer_kernel(%arg0: memref<8x8x128xf32, #tpu.memory_space<vmem>>, %arg1: memref<8x8xf32, #tpu.memory_space<vmem>>, %arg2: memref<128x384xbf16, #tpu.memory_space<vmem>>, %arg3: memref<1x384xf32, #tpu.memory_space<vmem>>, %arg4: memref<128x128xbf16, #tpu.memory_space<vmem>>, %arg5: memref<1x128xf32, #tpu.memory_space<vmem>>, %arg6: memref<1x128xf32, #tpu.memory_space<vmem>>, %arg7: memref<1x128xf32, #tpu.memory_space<vmem>>, %arg8: memref<1x128xf32, #tpu.memory_space<vmem>>, %arg9: memref<1x128xf32, #tpu.memory_space<vmem>>, %arg10: memref<128x256xbf16, #tpu.memory_space<vmem>>, %arg11: memref<1x256xf32, #tpu.memory_space<vmem>>, %arg12: memref<256x128xbf16, #tpu.memory_space<vmem>>, %arg13: memref<1x128xf32, #tpu.memory_space<vmem>>, %arg14: memref<64x128xf32, #tpu.memory_space<vmem>>) attributes {dimension_semantics = [], scalar_prefetch = 0 : i64, scratch_operands = 0 : i64, tpu.core_type = #tpu.core_type<tc>} {
    %c0 = arith.constant 0 : index
    %c0_0 = arith.constant 0 : index
    %c0_1 = arith.constant 0 : index
    %0 = vector.load %arg0[%c0, %c0_0, %c0_1] : memref<8x8x128xf32, #tpu.memory_space<vmem>>, vector<8x8x128xf32>
    %1 = vector.shape_cast %0 : vector<8x8x128xf32> to vector<64x128xf32>
    %2 = arith.truncf %1 : vector<64x128xf32> to vector<64x128xbf16>
    %c0_2 = arith.constant 0 : index
    %c0_3 = arith.constant 0 : index
    %3 = vector.load %arg2[%c0_2, %c0_3] : memref<128x384xbf16, #tpu.memory_space<vmem>>, vector<128x384xbf16>
    %cst = arith.constant dense<0.000000e+00> : vector<64x384xf32>
    %4 = tpu.matmul %2, %3, %cst {dimension_numbers = #tpu.dot_dimension_numbers<[1], [0], [0], [1], [0, 0, 1, 1], [], []>} : vector<64x128xbf16>, vector<128x384xbf16>, vector<64x384xf32> -> vector<64x384xf32>
    %c0_4 = arith.constant 0 : index
    %c0_5 = arith.constant 0 : index
    %5 = vector.load %arg3[%c0_4, %c0_5] : memref<1x384xf32, #tpu.memory_space<vmem>>, vector<1x384xf32>
    %6 = vector.broadcast %5 : vector<1x384xf32> to vector<64x384xf32>
    %7 = arith.addf %4, %6 : vector<64x384xf32>
    %8 = vector.extract_strided_slice %7 {offsets = [0, 0], sizes = [64, 128], strides = [1, 1]} : vector<64x384xf32> to vector<64x128xf32>
    %9 = vector.shape_cast %8 : vector<64x128xf32> to vector<8x8x128xf32>
    %10 = vector.extract_strided_slice %7 {offsets = [0, 128], sizes = [64, 128], strides = [1, 1]} : vector<64x384xf32> to vector<64x128xf32>
    %11 = vector.shape_cast %10 : vector<64x128xf32> to vector<8x8x128xf32>
    %12 = vector.extract_strided_slice %7 {offsets = [0, 256], sizes = [64, 128], strides = [1, 1]} : vector<64x384xf32> to vector<64x128xf32>
    %13 = vector.shape_cast %12 : vector<64x128xf32> to vector<8x8x128xf32>
    %14 = arith.truncf %9 : vector<8x8x128xf32> to vector<8x8x128xbf16>
    %15 = arith.truncf %11 : vector<8x8x128xf32> to vector<8x8x128xbf16>
    "tpu.trace_start"() <{level = 10 : i32, message = "bqd,bkd->bqk"}> : () -> ()
    %cst_6 = arith.constant dense<0.000000e+00> : vector<8x8x8xf32>
    %16 = tpu.matmul %14, %15, %cst_6 {dimension_numbers = #tpu.dot_dimension_numbers<[2], [2], [1], [1], [0, 0, 0, 1, 1, 1], [0], [0]>} : vector<8x8x128xbf16>, vector<8x8x128xbf16>, vector<8x8x8xf32> -> vector<8x8x8xf32>
    "tpu.trace_stop"() : () -> ()
    %c0_7 = arith.constant 0 : index
    %c0_8 = arith.constant 0 : index
    %17 = vector.load %arg1[%c0_7, %c0_8] : memref<8x8xf32, #tpu.memory_space<vmem>>, vector<8x8xf32>
    %18 = vector.shape_cast %17 : vector<8x8xf32> to vector<8x1x8xf32>
    %19 = vector.broadcast %18 : vector<8x1x8xf32> to vector<8x8x8xf32>
    %20 = arith.addf %16, %19 : vector<8x8x8xf32>
    %cst_9 = arith.constant dense<0xFF800000> : vector<8x8xf32>
    %21 = vector.multi_reduction <maximumf>, %20, %cst_9 [2] : vector<8x8x8xf32> to vector<8x8xf32>
    %22 = vector.shape_cast %21 : vector<8x8xf32> to vector<8x8x1xf32>
    %23 = vector.broadcast %22 : vector<8x8x1xf32> to vector<8x8x8xf32>
    %24 = arith.subf %20, %23 : vector<8x8x8xf32>
    %25 = math.exp %24 : vector<8x8x8xf32>
    %cst_10 = arith.constant dense<0.000000e+00> : vector<8x8xf32>
    %26 = vector.multi_reduction <add>, %25, %cst_10 [2] : vector<8x8x8xf32> to vector<8x8xf32>
    %27 = vector.shape_cast %26 : vector<8x8xf32> to vector<8x8x1xf32>
    %28 = tpu.reciprocal %27 {approx = true} : vector<8x8x1xf32> -> vector<8x8x1xf32>
    %29 = vector.broadcast %28 : vector<8x8x1xf32> to vector<8x8x8xf32>
    %30 = arith.mulf %25, %29 : vector<8x8x8xf32>
    %31 = arith.truncf %30 : vector<8x8x8xf32> to vector<8x8x8xbf16>
    %32 = arith.truncf %13 : vector<8x8x128xf32> to vector<8x8x128xbf16>
    "tpu.trace_start"() <{level = 10 : i32, message = "bqk,bkd->bqd"}> : () -> ()
    %cst_11 = arith.constant dense<0.000000e+00> : vector<8x8x128xf32>
    %33 = tpu.matmul %31, %32, %cst_11 {dimension_numbers = #tpu.dot_dimension_numbers<[2], [1], [1], [2], [0, 0, 0, 1, 1, 2], [0], [0]>} : vector<8x8x8xbf16>, vector<8x8x128xbf16>, vector<8x8x128xf32> -> vector<8x8x128xf32>
    "tpu.trace_stop"() : () -> ()
    %34 = vector.shape_cast %33 : vector<8x8x128xf32> to vector<64x128xf32>
    %35 = arith.truncf %34 : vector<64x128xf32> to vector<64x128xbf16>
    %c0_12 = arith.constant 0 : index
    %c0_13 = arith.constant 0 : index
    %36 = vector.load %arg4[%c0_12, %c0_13] : memref<128x128xbf16, #tpu.memory_space<vmem>>, vector<128x128xbf16>
    %cst_14 = arith.constant dense<0.000000e+00> : vector<64x128xf32>
    %37 = tpu.matmul %35, %36, %cst_14 {dimension_numbers = #tpu.dot_dimension_numbers<[1], [0], [0], [1], [0, 0, 1, 1], [], []>} : vector<64x128xbf16>, vector<128x128xbf16>, vector<64x128xf32> -> vector<64x128xf32>
    %c0_15 = arith.constant 0 : index
    %c0_16 = arith.constant 0 : index
    %38 = vector.load %arg5[%c0_15, %c0_16] : memref<1x128xf32, #tpu.memory_space<vmem>>, vector<1x128xf32>
    %39 = vector.broadcast %38 : vector<1x128xf32> to vector<64x128xf32>
    %40 = arith.addf %37, %39 : vector<64x128xf32>
    %41 = vector.shape_cast %40 : vector<64x128xf32> to vector<8x8x128xf32>
    %42 = tpu.transpose %41, [1, 0, 2] : vector<8x8x128xf32> -> vector<8x8x128xf32>
    %43 = arith.addf %42, %0 : vector<8x8x128xf32>
    %44 = vector.shape_cast %43 : vector<8x8x128xf32> to vector<64x128xf32>
    %c0_17 = arith.constant 0 : index
    %c0_18 = arith.constant 0 : index
    %45 = vector.load %arg6[%c0_17, %c0_18] : memref<1x128xf32, #tpu.memory_space<vmem>>, vector<1x128xf32>
    %c0_19 = arith.constant 0 : index
    %c0_20 = arith.constant 0 : index
    %46 = vector.load %arg7[%c0_19, %c0_20] : memref<1x128xf32, #tpu.memory_space<vmem>>, vector<1x128xf32>
    %cst_21 = arith.constant dense<0.000000e+00> : vector<64xf32>
    %47 = vector.multi_reduction <add>, %44, %cst_21 [1] : vector<64x128xf32> to vector<64xf32>
    %48 = vector.shape_cast %47 : vector<64xf32> to vector<64x1xf32>
    %cst_22 = arith.constant 1.280000e+02 : f32
    %49 = vector.broadcast %cst_22 : f32 to vector<64x1xf32>
    %50 = arith.divf %48, %49 : vector<64x1xf32>
    %51 = vector.broadcast %50 : vector<64x1xf32> to vector<64x128xf32>
    %52 = arith.subf %44, %51 : vector<64x128xf32>
    %53 = arith.mulf %52, %52 : vector<64x128xf32>
    %cst_23 = arith.constant dense<0.000000e+00> : vector<64xf32>
    %54 = vector.multi_reduction <add>, %53, %cst_23 [1] : vector<64x128xf32> to vector<64xf32>
    %55 = vector.shape_cast %54 : vector<64xf32> to vector<64x1xf32>
    %cst_24 = arith.constant 1.280000e+02 : f32
    %56 = vector.broadcast %cst_24 : f32 to vector<64x1xf32>
    %57 = arith.divf %55, %56 : vector<64x1xf32>
    %58 = vector.broadcast %50 : vector<64x1xf32> to vector<64x128xf32>
    %59 = arith.subf %44, %58 : vector<64x128xf32>
    %cst_25 = arith.constant 9.99999974E-6 : f32
    %60 = vector.broadcast %cst_25 : f32 to vector<64x1xf32>
    %61 = arith.addf %57, %60 : vector<64x1xf32>
    %62 = math.rsqrt %61 : vector<64x1xf32>
    %63 = vector.broadcast %62 : vector<64x1xf32> to vector<64x128xf32>
    %64 = arith.mulf %59, %63 : vector<64x128xf32>
    %65 = vector.broadcast %45 : vector<1x128xf32> to vector<64x128xf32>
    %66 = arith.mulf %64, %65 : vector<64x128xf32>
    %67 = vector.broadcast %46 : vector<1x128xf32> to vector<64x128xf32>
    %68 = arith.addf %66, %67 : vector<64x128xf32>
    %69 = arith.truncf %68 : vector<64x128xf32> to vector<64x128xbf16>
    %c0_26 = arith.constant 0 : index
    %c0_27 = arith.constant 0 : index
    %70 = vector.load %arg10[%c0_26, %c0_27] : memref<128x256xbf16, #tpu.memory_space<vmem>>, vector<128x256xbf16>
    %cst_28 = arith.constant dense<0.000000e+00> : vector<64x256xf32>
    %71 = tpu.matmul %69, %70, %cst_28 {dimension_numbers = #tpu.dot_dimension_numbers<[1], [0], [0], [1], [0, 0, 1, 1], [], []>} : vector<64x128xbf16>, vector<128x256xbf16>, vector<64x256xf32> -> vector<64x256xf32>
    %c0_29 = arith.constant 0 : index
    %c0_30 = arith.constant 0 : index
    %72 = vector.load %arg11[%c0_29, %c0_30] : memref<1x256xf32, #tpu.memory_space<vmem>>, vector<1x256xf32>
    %73 = vector.broadcast %72 : vector<1x256xf32> to vector<64x256xf32>
    %74 = arith.addf %71, %73 : vector<64x256xf32>
    %cst_31 = arith.constant 0.000000e+00 : f32
    %75 = vector.broadcast %cst_31 : f32 to vector<64x256xf32>
    %76 = arith.maximumf %74, %75 : vector<64x256xf32>
    %77 = arith.truncf %76 : vector<64x256xf32> to vector<64x256xbf16>
    %c0_32 = arith.constant 0 : index
    %c0_33 = arith.constant 0 : index
    %78 = vector.load %arg12[%c0_32, %c0_33] : memref<256x128xbf16, #tpu.memory_space<vmem>>, vector<256x128xbf16>
    %cst_34 = arith.constant dense<0.000000e+00> : vector<64x128xf32>
    %79 = tpu.matmul %77, %78, %cst_34 {dimension_numbers = #tpu.dot_dimension_numbers<[1], [0], [0], [1], [0, 0, 1, 1], [], []>} : vector<64x256xbf16>, vector<256x128xbf16>, vector<64x128xf32> -> vector<64x128xf32>
    %c0_35 = arith.constant 0 : index
    %c0_36 = arith.constant 0 : index
    %80 = vector.load %arg13[%c0_35, %c0_36] : memref<1x128xf32, #tpu.memory_space<vmem>>, vector<1x128xf32>
    %81 = vector.broadcast %80 : vector<1x128xf32> to vector<64x128xf32>
    %82 = arith.addf %79, %81 : vector<64x128xf32>
    %83 = arith.addf %68, %82 : vector<64x128xf32>
    %c0_37 = arith.constant 0 : index
    %c0_38 = arith.constant 0 : index
    %84 = vector.load %arg8[%c0_37, %c0_38] : memref<1x128xf32, #tpu.memory_space<vmem>>, vector<1x128xf32>
    %c0_39 = arith.constant 0 : index
    %c0_40 = arith.constant 0 : index
    %85 = vector.load %arg9[%c0_39, %c0_40] : memref<1x128xf32, #tpu.memory_space<vmem>>, vector<1x128xf32>
    %cst_41 = arith.constant dense<0.000000e+00> : vector<64xf32>
    %86 = vector.multi_reduction <add>, %83, %cst_41 [1] : vector<64x128xf32> to vector<64xf32>
    %87 = vector.shape_cast %86 : vector<64xf32> to vector<64x1xf32>
    %cst_42 = arith.constant 1.280000e+02 : f32
    %88 = vector.broadcast %cst_42 : f32 to vector<64x1xf32>
    %89 = arith.divf %87, %88 : vector<64x1xf32>
    %90 = vector.broadcast %89 : vector<64x1xf32> to vector<64x128xf32>
    %91 = arith.subf %83, %90 : vector<64x128xf32>
    %92 = arith.mulf %91, %91 : vector<64x128xf32>
    %cst_43 = arith.constant dense<0.000000e+00> : vector<64xf32>
    %93 = vector.multi_reduction <add>, %92, %cst_43 [1] : vector<64x128xf32> to vector<64xf32>
    %94 = vector.shape_cast %93 : vector<64xf32> to vector<64x1xf32>
    %cst_44 = arith.constant 1.280000e+02 : f32
    %95 = vector.broadcast %cst_44 : f32 to vector<64x1xf32>
    %96 = arith.divf %94, %95 : vector<64x1xf32>
    %97 = vector.broadcast %89 : vector<64x1xf32> to vector<64x128xf32>
    %98 = arith.subf %83, %97 : vector<64x128xf32>
    %cst_45 = arith.constant 9.99999974E-6 : f32
    %99 = vector.broadcast %cst_45 : f32 to vector<64x1xf32>
    %100 = arith.addf %96, %99 : vector<64x1xf32>
    %101 = math.rsqrt %100 : vector<64x1xf32>
    %102 = vector.broadcast %101 : vector<64x1xf32> to vector<64x128xf32>
    %103 = arith.mulf %98, %102 : vector<64x128xf32>
    %104 = vector.broadcast %84 : vector<1x128xf32> to vector<64x128xf32>
    %105 = arith.mulf %103, %104 : vector<64x128xf32>
    %106 = vector.broadcast %85 : vector<1x128xf32> to vector<64x128xf32>
    %107 = arith.addf %105, %106 : vector<64x128xf32>
    %c0_46 = arith.constant 0 : index
    %c0_47 = arith.constant 0 : index
    %108 = vector.load %arg14[%c0_46, %c0_47] : memref<64x128xf32, #tpu.memory_space<vmem>>, vector<64x128xf32>
    tpu.vector_store %arg14[%c0_46, %c0_47], %107 {strides = array<i32>} : memref<64x128xf32, #tpu.memory_space<vmem>>, vector<64x128xf32>,
    return
  }
}

</mosaic_0001>

<bundles_post_ra>
// kernel: tpu_custom_call.1
= control target key start
LH: loop header
LB: loop body
LE: loop exit
PB: predicated region body
PF: predicated region fallthrough
CT: control target
= control target key end

     0   :  { %19 = vsyncpa [#allocation3], 0  ;;  %s3468_s0 = inlined_call_operand.hbm [shape: f32[8,8,128], index: 0, kind: input, shape index: {}]   ;;  %s3469_s1 = inlined_call_operand.hbm [shape: f32[8,8], index: 1, kind: input, shape index: {}]   ;;  %s3470_s2 = inlined_call_operand.hbm [shape: bf16[128,384], index: 2, kind: input, shape index: {}]   ;;  %s3471_s3 = inlined_call_operand.vmem [shape: f32[1,384], index: 3, kind: input, shape index: {}]   ;;  %s3472_s4 = inlined_call_operand.hbm [shape: bf16[128,128], index: 4, kind: input, shape index: {}]   ;;  %s3473_s5 = inlined_call_operand.vmem [shape: f32[1,128], index: 5, kind: input, shape index: {}]   ;;  %s3474_s6 = inlined_call_operand.vmem [shape: f32[1,128], index: 6, kind: input, shape index: {}]   ;;  %s3475_s7 = inlined_call_operand.vmem [shape: f32[1,128], index: 7, kind: input, shape index: {}]   ;;  %s3476_s8 = inlined_call_operand.vmem [shape: f32[1,128], index: 8, kind: input, shape index: {}]   ;;  %s3477_s9 = inlined_call_operand.vmem [shape: f32[1,128], index: 9, kind: input, shape index: {}]   ;;  %s3478_s10 = inlined_call_operand.hbm [shape: bf16[128,256], index: 10, kind: input, shape index: {}]   ;;  %s3479_s11 = inlined_call_operand.vmem [shape: f32[1,256], index: 11, kind: input, shape index: {}]   ;;  %s3480_s12 = inlined_call_operand.hbm [shape: bf16[256,128], index: 12, kind: input, shape index: {}]   ;;  %s3481_s13 = inlined_call_operand.vmem [shape: f32[1,128], index: 13, kind: input, shape index: {}]   ;;  %s3482_s14 = inlined_call_operand.hbm [shape: f32[64,128], index: 14, kind: output, shape index: {}]  }
   0x1   :  { %20 = vsyncpa [#allocation6], 0 }
   0x2   :  { %21 = vsyncpa [#allocation9], 0 }
   0x3   :  { %22 = vsyncpa [#allocation12], 0 }
   0x4   :  { %23 = vsyncpa [#allocation4], 0  ;;  %s2975_s29 = smov [#allocation5]   ;;  %s2976_s15 = smov [#allocation8]  }
   0x5   :  { %s42_s30 = sshll.u32 %s2975_s29, 4  ;;  %s65_s16 = sshll.u32 %s2976_s15, 4  ;;  %s43_s30 = int_to_ptr.vmem [resolvable:$true] %s42_s30  ;;  %s66_s16 = int_to_ptr.vmem [resolvable:$true] %s65_s16 }
   0x6   :  { %s2833_s17 = scalar_lea.vmem %s43_s30, 128  ;;  %p2838_p1 = scmp.lt.s32.totalorder %s43_s30, %s43_s30 }
   0x7   :  { %p2834_p0 = scmp.ne.s32.totalorder %s43_s30, %s2833_s17  ;;  %p2839_p2 = scmp.lt.s32.totalorder %s2833_s17, %s2833_s17 }
   0x9   :  { %p2840_p3 = por %p2839_p2, %p2838_p1 }
   0xb   :  { %p2841_p4 = pnand %p2840_p3, %p2834_p0 }
   0xd   :  { %2844 = shalt.err (!%p2841_p4)
}
   0xe   :  { %45 = dma.hbm_to_vmem [thread:$0]  %s3469_s1, 128, %s43_s30, [#allocation6]  }
   0xf   :  { %s2853_s20 = scalar_lea.vmem %s66_s16, 1024  ;;  %p2858_p6 = scmp.lt.s32.totalorder %s66_s16, %s66_s16 }
  0x10   :  { %p2854_p5 = scmp.ne.s32.totalorder %s66_s16, %s2853_s20  ;;  %p2859_p7 = scmp.lt.s32.totalorder %s2853_s20, %s2853_s20 }
  0x12   :  { %p2860_p8 = por %p2859_p7, %p2858_p6 }
  0x14   :  { %p2861_p9 = pnand %p2860_p8, %p2854_p5 }
  0x16   :  { %2864 = shalt.err (!%p2861_p9)
}
  0x17   :  { %s2977_s21 = smov 64   ;;  %s2978_s22 = smov 4  }
  0x18   :  { %71 = dma.hbm_to_vmem [thread:$0]  %s3472_s4, 1024, %s66_s16, [#allocation9], %s2977_s21, %s2977_s21, %s2978_s22  }
  0x19   :  { %s2979_s25 = smov [#allocation2]  }
  0x1a   :  { %s29_s26 = sshll.u32 %s2979_s25, 4  ;;  %s30_s26 = int_to_ptr.vmem [resolvable:$true] %s29_s26 }
  0x1b   :  { %s2873_s1 = scalar_lea.vmem %s30_s26, 1024  ;;  %p2878_p11 = scmp.lt.s32.totalorder %s30_s26, %s30_s26 }
  0x1c   :  { %p2874_p10 = scmp.ne.s32.totalorder %s30_s26, %s2873_s1  ;;  %p2879_p12 = scmp.lt.s32.totalorder %s2873_s1, %s2873_s1 }
  0x1e   :  { %p2880_p13 = por %p2879_p12, %p2878_p11 }
  0x20   :  { %p2881_p0 = pnand %p2880_p13, %p2874_p10 }
  0x22   :  { %2884 = shalt.err (!%p2881_p0)
}
  0x23   :  { %s2980_s27 = smov 128   ;;  %s2981_s28 = smov 8  }
  0x24   :  { %35 = dma.hbm_to_vmem [thread:$0]  %s3468_s0, 1024, %s30_s26, [#allocation3], %s2980_s27, %s2980_s27, %s2981_s28  }
  0x25   :  { %s2982_s4 = smov [#allocation7]  }
  0x26   :  { %s51_s15 = sshll.u32 %s2982_s4, 4  ;;  %s52_s15 = int_to_ptr.vmem [resolvable:$true] %s51_s15 }
  0x27   :  { %s2893_s16 = scalar_lea.vmem %s52_s15, 3072  ;;  %p2898_p2 = scmp.lt.s32.totalorder %s52_s15, %s52_s15 }
  0x28   :  { %p2894_p1 = scmp.ne.s32.totalorder %s52_s15, %s2893_s16  ;;  %p2899_p3 = scmp.lt.s32.totalorder %s2893_s16, %s2893_s16 }
  0x2a   :  { %p2900_p4 = por %p2899_p3, %p2898_p2 }
  0x2c   :  { %p2901_p5 = pnand %p2900_p4, %p2894_p1 }
  0x2e   :  { %2904 = shalt.err (!%p2901_p5)
}
  0x2f   :  { %s2983_s17 = smov 192   ;;  %s2984_s18 = smov 12  }
  0x30   :  { %57 = dma.hbm_to_vmem [thread:$0]  %s3470_s2, 3072, %s52_s15, [#allocation6], %s2983_s17, %s2983_s17, %s2984_s18  }
  0x31   :  { %s2985_s23 = smov [#allocation10]   ;;  %s2986_s25 = smov [#allocation11]  }
  0x32   :  { %s87_s24 = sshll.u32 %s2985_s23, 4  ;;  %s101_s0 = sshll.u32 %s2986_s25, 4  ;;  %s88_s24 = int_to_ptr.vmem [resolvable:$true] %s87_s24  ;;  %s102_s0 = int_to_ptr.vmem [resolvable:$true] %s101_s0 }
  0x33   :  { %s2913_s26 = scalar_lea.vmem %s88_s24, 2048  ;;  %p2918_p7 = scmp.lt.s32.totalorder %s88_s24, %s88_s24 }
  0x34   :  { %p2914_p6 = scmp.ne.s32.totalorder %s88_s24, %s2913_s26  ;;  %p2919_p8 = scmp.lt.s32.totalorder %s2913_s26, %s2913_s26 }
  0x36   :  { %p2920_p9 = por %p2919_p8, %p2918_p7 }
  0x38   :  { %p2921_p10 = pnand %p2920_p9, %p2914_p6 }
  0x3a   :  { %2924 = shalt.err (!%p2921_p10)
}
  0x3b   :  { %93 = dma.hbm_to_vmem [thread:$0]  %s3478_s10, 2048, %s88_s24, [#allocation9], %s2980_s27, %s2980_s27, %s2981_s28  }
  0x3c   :  { %s2933_s2 = scalar_lea.vmem %s102_s0, 2048  ;;  %p2938_p12 = scmp.lt.s32.totalorder %s102_s0, %s102_s0 }
  0x3d   :  { %p2934_p11 = scmp.ne.s32.totalorder %s102_s0, %s2933_s2  ;;  %p2939_p13 = scmp.lt.s32.totalorder %s2933_s2, %s2933_s2 }
  0x3f   :  { %p2940_p0 = por %p2939_p13, %p2938_p12 }
  0x41   :  { %p2941_p1 = pnand %p2940_p0, %p2934_p11 }
  0x43   :  { %2944 = shalt.err (!%p2941_p1)
}
  0x44   :  { %107 = dma.hbm_to_vmem [thread:$0]  %s3480_s12, 2048, %s102_s0, [#allocation12], %s2977_s21, %s2977_s21, %s2978_s22  }
  0x45   :  { %2965 = dma.done.wait [#allocation3], 1024  }
  0x46   :  { %2966 = vsyncadd [#allocation3], 4294966272 }
  0x47   :  { %2967 = dma.done.wait [#allocation6], 3200  }
  0x48   :  { %2968 = vsyncadd [#allocation6], 4294964096 }
  0x49   :  { %2969 = dma.done.wait [#allocation9], 3072  }
  0x4a   :  { %2970 = vsyncadd [#allocation9], 4294964224 }
  0x4b   :  { %2971 = dma.done.wait [#allocation12], 2048  }
  0x4c   :  { %2972 = vsyncadd [#allocation12], 4294965248  ;;  %v2987_v0 = vmov 0   ;;  %v2676_v1 = vld [vmem:[#allocation7 + $0xac] ss:$12 sps:$4 sm:$0xff]   ;;  %v130_v10 = vld [vmem:[#allocation2 + $0x8] sm:$0xff]  ;;  %v175_v38 = vlaneseq }
  0x4d   :  { %350 = vmatprep.mubr.bf16.mxu0 %v2987_v0  ;;  %v2678_v2 = vld [vmem:[#allocation7 + $0xa8] ss:$12 sps:$4 sm:$0xff]   ;;  %318 = vmatprep.subr.bf16.mxu0 %v2676_v1  ;;  %v2681_v4 = vld [vmem:[#allocation7 + $0x90] ss:$12 sps:$4 sm:$0xff]   ;;  %v2684_v6 = vld [vmem:[#allocation7 + $0x78] ss:$12 sps:$4 sm:$0xff]  }
  0x4e   :  { %v2679_v3 = vld [vmem:[#allocation7 + $0x94] ss:$12 sps:$4 sm:$0xff]   ;;  %319 = vmatpush1.bf16.msra.mxu0 %v2678_v2  ;;  %v2682_v5 = vld [vmem:[#allocation7 + $0x7c] ss:$12 sps:$4 sm:$0xff]   ;;  %v2685_v7 = vld [vmem:[#allocation7 + $0x64] ss:$12 sps:$4 sm:$0xff]  }
  0x4f   :  { %320 = vmatprep.subr.bf16.mxu0 %v2679_v3  ;;  %v129_v8 = vld [vmem:[#allocation2] sm:$0xff]  ;;  %v2687_v9 = vld [vmem:[#allocation7 + $0x60] ss:$12 sps:$4 sm:$0xff]   ;;  %v2690_v13 = vld [vmem:[#allocation7 + $0x48] ss:$12 sps:$4 sm:$0xff]   ;;  %v2988_v37 = vmov 0.0  }
  0x50   :  { %v2688_v11 = vld [vmem:[#allocation7 + $0x4c] ss:$12 sps:$4 sm:$0xff]   ;;  %v137_v12 = vpack.c.bf16 %v130_v10, %v129_v8  ;;  %v2700_v14 = vld [vmem:[#allocation7 + $0xb0] ss:$12 sps:$4 sm:$0xff]   ;;  %v2691_v16 = vld [vmem:[#allocation7 + $0x34] ss:$12 sps:$4 sm:$0xff]  }
  0x51   :  { %v2701_v15 = vld [vmem:[#allocation7 + $0x98] ss:$12 sps:$4 sm:$0xff]   ;;  %2497 = vmatprep.subr.bf16.mxu1 %v2700_v14  ;;  %v2702_v17 = vld [vmem:[#allocation7 + $0x80] ss:$12 sps:$4 sm:$0xff]   ;;  %v2693_v18 = vld [vmem:[#allocation7 + $0x30] ss:$12 sps:$4 sm:$0xff]  }
  0x52   :  { %321 = vmatpush1.bf16.msra.mxu0 %v2681_v4  ;;  %2513 = vmatprep.mubr.bf16.mxu1 %v137_v12  ;;  %v2694_v19 = vld [vmem:[#allocation7 + $0x1c] ss:$12 sps:$4 sm:$0xff]   ;;  %v2696_v20 = vld [vmem:[#allocation7 + $0x18] ss:$12 sps:$4 sm:$0xff]   ;;  %v2699_v24 = vld [vmem:[#allocation7] ss:$12 sps:$4 sm:$0xff]  }
  0x53   :  { %322 = vmatprep.subr.bf16.mxu0 %v2682_v5  ;;  %2498 = vmatpush3.bf16.msra.mxu1 %v2700_v14  ;;  %v2703_v21 = vld [vmem:[#allocation7 + $0x68] ss:$12 sps:$4 sm:$0xff]   ;;  %v2697_v22 = vld [vmem:[#allocation7 + $0x4] ss:$12 sps:$4 sm:$0xff]   ;;  %v2706_v26 = vld [vmem:[#allocation7 + $0x20] ss:$12 sps:$4 sm:$0xff]  }
  0x54   :  { %2499 = vmatprep.subr.bf16.mxu1 %v2701_v15  ;;  %v2704_v23 = vld [vmem:[#allocation7 + $0x50] ss:$12 sps:$4 sm:$0xff]   ;;  %v2705_v25 = vld [vmem:[#allocation7 + $0x38] ss:$12 sps:$4 sm:$0xff]   ;;  %v131_v27 = vld [vmem:[#allocation2 + $0x10] sm:$0xff]  ;;  %vm2989_vm0 = vmmov 0  }
  0x55   :  { %v132_v28 = vld [vmem:[#allocation2 + $0x18] sm:$0xff]  ;;  %v3102_v31 = vld [vmem:[#allocation2 + $0x20] sm:$0xff]  ;;  %v3104_v32 = vld [vmem:[#allocation2 + $0x28] sm:$0xff]  ;;  %v3121_v39 = vshrl.u32 %v175_v38, 7  ;;  %vm991_vm1 = vcmask 1043456   ;;  %vm883_vm2 = vcmask 64512  }
  0x56   :  { %323 = vmatpush1.bf16.msra.mxu0 %v2684_v6  ;;  %v2707_v29 = vld [vmem:[#allocation7 + $0x8] ss:$12 sps:$4 sm:$0xff]   ;;  %v138_v30 = vpack.c.bf16 %v132_v28, %v131_v27  ;;  %v139_v33 = vpack.c.bf16 %v3104_v32, %v3102_v31  ;;  %v173_v41 = vld [vmem:[%s3471_s3] sm:$0x7] }
  0x57   :  { %324 = vmatprep.subr.bf16.mxu0 %v2685_v7  ;;  %2500 = vmatpush3.bf16.msra.mxu1 %v2701_v15  ;;  %v3109_v34 = vld [vmem:[#allocation2 + $0x30] sm:$0xff]  ;;  %v3111_v35 = vld [vmem:[#allocation2 + $0x38] sm:$0xff]  ;;  %v181_v40 = vsub.s32 1, %v3121_v39  ;;  %v3132_v43 = vsub.s32 0, %v3121_v39  ;;  %v185_v51 = vsub.s32 2, %v3121_v39 }
  0x58   :  { %2501 = vmatprep.subr.bf16.mxu1 %v2702_v17  ;;  %v140_v36 = vpack.c.bf16 %v3111_v35, %v3109_v34 }
  0x59   :  { %v3129_v42 = vrot.slane %v173_v41, %v181_v40  ;;  %v3136_v47 = vrot.slane %v173_v41, %v3132_v43  ;;  %v3143_v57 = vrot.slane %v173_v41, %v185_v51 }
  0x5a   :  { %325 = vmatpush1.bf16.msra.mxu0 %v2687_v9 }
  0x5b   :  { %326 = vmatprep.subr.bf16.mxu0 %v2688_v11  ;;  %2502 = vmatpush3.bf16.msra.mxu1 %v2702_v17 }
  0x5c   :  { %2503 = vmatprep.subr.bf16.mxu1 %v2703_v21 }
  0x5e   :  { %327 = vmatpush1.bf16.msra.mxu0 %v2690_v13 }
  0x5f   :  { %328 = vmatprep.subr.bf16.mxu0 %v2691_v16  ;;  %2504 = vmatpush3.bf16.msra.mxu1 %v2703_v21 }
  0x60   :  { %2505 = vmatprep.subr.bf16.mxu1 %v2704_v23 }
  0x62   :  { %329 = vmatpush1.bf16.msra.mxu0 %v2693_v18 }
  0x63   :  { %330 = vmatprep.subr.bf16.mxu0 %v2694_v19  ;;  %2506 = vmatpush3.bf16.msra.mxu1 %v2704_v23 }
  0x64   :  { %2507 = vmatprep.subr.bf16.mxu1 %v2705_v25 }
  0x66   :  { %331 = vmatpush1.bf16.msra.mxu0 %v2696_v20 }
  0x67   :  { %332 = vmatprep.subr.bf16.mxu0 %v2697_v22  ;;  %2508 = vmatpush3.bf16.msra.mxu1 %v2705_v25 }
  0x68   :  { %2509 = vmatprep.subr.bf16.mxu1 %v2706_v26 }
  0x6a   :  { %333 = vmatpush1.bf16.msra.mxu0 %v2699_v24 }
  0x6b   :  { %2510 = vmatpush3.bf16.msra.mxu1 %v2706_v26  ;;  %2533 = vmatprep.subr.bf16.mxu0 %v2988_v37 }
  0x6c   :  { %2511 = vmatprep.subr.bf16.mxu1 %v2707_v29 }
  0x6d   :  { %351 = vmatmul.mubr.bf16.vlgmr.msra.gmra.mxu0 %v137_v12 }
  0x6e   :  { %360 = vmatprep.mubr.bf16.mxu0 %v2987_v0 }
  0x6f   :  { %2512 = vmatpush3.bf16.msra.mxu1 %v2707_v29 }
  0x70   :  { %2521 = vmatprep.subr.bf16.mxu1 %v2988_v37 }
  0x72   :  { %2514 = vmatmul.mubr.bf16.vlgmr.msra.gmra.mxu1 %v138_v30 }
  0x73   :  { %2517 = vmatprep.mubr.bf16.mxu1 %v139_v33 }
  0x75   :  { %361 = vmatmul.mubr.bf16.gmra.mxu0 %v138_v30 }
  0x76   :  { %370 = vmatprep.mubr.bf16.mxu0 %v2987_v0 }
  0x7a   :  { %2518 = vmatmul.mubr.bf16.gmra.mxu1 %v140_v36 }
  0x7b   :  { %2523 = vmatprep.mubr.msk.bf16.mxu1 %vm2989_vm0, %v2988_v37 }
  0x7d   :  { %371 = vmatmul.mubr.bf16.gmra.mxu0 %v139_v33 }
  0x7e   :  { %380 = vmatprep.mubr.bf16.mxu0 %v2987_v0 }
  0x85   :  { %381 = vmatmul.mubr.bf16.gmra.mxu0 %v140_v36 }
  0x86   :  { %2535 = vmatprep.mubr.msk.bf16.mxu0 %vm2989_vm0, %v2988_v37 }
 0x12d   :  { %v352_v44 = vpop.f32.mrf.mxu0 }
 0x12e   :  { %v353_v52 = vadd.f32 %v352_v44, %v3136_v47 }
 0x12f   :  { %v354_v45 = vpop.f32.mrf.mxu0 }
 0x130   :  { %v355_v46 = vadd.f32 %v354_v45, %v3129_v42  ;;  %v456_v58 = vpack.c.bf16 %v353_v52, %v353_v52 }
 0x131   :  { %v356_v48 = vpop.f32.mrf.mxu0 }
 0x132   :  { %v464_v49 = vpack.c.bf16 %v355_v46, %v355_v46  ;;  %v2515_v63 = vpop.f32.mrf.mxu1  ;;  %v357_v2 = vadd.f32 %v356_v48, %v3136_v47 }
 0x133   :  { %v358_v50 = vpop.f32.mrf.mxu0  ;;  %v434_v1 = vadd.f32 %v2515_v63, %v3143_v57 }
 0x134   :  { %2522 = vmatpush3.bf16.xpose.msra.mxu1 %v464_v49  ;;  %v359_v54 = vadd.f32 %v358_v50, %v3129_v42  ;;  %v425_v5 = vpop.f32.mrf.mxu1  ;;  %v457_v12 = vpack.c.bf16 %v357_v2, %v357_v2 }
 0x135   :  { %v362_v53 = vpop.f32.mrf.mxu0  ;;  %2527 = vmatprep.subr.bf16.mxu1 %v2988_v37  ;;  %v982_v7 = vpack.c.bf16 %v434_v1, %v434_v1  ;;  %v426_v49 = vadd.f32 %v425_v5, %v3143_v57 }
 0x136   :  { %v465_v60 = vpack.c.bf16 %v359_v54, %v359_v54  ;;  %v363_v3 = vadd.f32 %v362_v53, %v3136_v47  ;;  %v2516_v9 = vpop.f32.mrf.mxu1 }
 0x137   :  { %v364_v55 = vpop.f32.mrf.mxu0  ;;  %v3155_v11 = vsel %vm991_vm1, %v982_v7, 0  ;;  %v437_v15 = vadd.f32 %v2516_v9, %v3143_v57  ;;  %v980_v1 = vpack.c.bf16 %v426_v49, %v426_v49 }
 0x138   :  { %v365_v56 = vadd.f32 %v364_v55, %v3129_v42  ;;  %v458_v13 = vpack.c.bf16 %v363_v3, %v363_v3  ;;  %v428_v16 = vpop.f32.mrf.mxu1 }
 0x139   :  { %v366_v59 = vpop.f32.mrf.mxu0  ;;  %v983_v20 = vpack.c.bf16 %v437_v15, %v437_v15  ;;  %v429_v5 = vadd.f32 %v428_v16, %v3143_v57  ;;  %v993_v7 = vsel %vm991_vm1, %v980_v1, 0 }
 0x13a   :  { %v466_v61 = vpack.c.bf16 %v365_v56, %v365_v56  ;;  %v2519_v21 = vpop.f32.mrf.mxu1  ;;  %v367_v22 = vadd.f32 %v366_v59, %v3136_v47 }
 0x13b   :  { %v368_v62 = vpop.f32.mrf.mxu0  ;;  %2524 = vmatmul.mubr.bf16.vlgmr.msra.gmra.mxu1 %v456_v58  ;;  %v3165_v25 = vsel %vm991_vm1, %v983_v20, 0  ;;  %v450_v26 = vadd.f32 %v2519_v21, %v3143_v57 }
 0x13c   :  { %2528 = vmatpush3.bf16.xpose.msra.mxu1 %v465_v60  ;;  %2534 = vmatpush3.bf16.xpose.msra.mxu0 %v466_v61  ;;  %v369_v6 = vadd.f32 %v368_v62, %v3129_v42  ;;  %v441_v27 = vpop.f32.mrf.mxu1  ;;  %v459_v45 = vpack.c.bf16 %v367_v22, %v367_v22 }
 0x13d   :  { %v372_v4 = vpop.f32.mrf.mxu0  ;;  %2529 = vmatprep.mubr.msk.bf16.mxu1 %vm2989_vm0, %v2988_v37  ;;  %2539 = vmatprep.subr.bf16.mxu1 %v2988_v37  ;;  %v442_v29 = vadd.f32 %v441_v27, %v3143_v57  ;;  %v986_v33 = vpack.c.bf16 %v450_v26, %v450_v26 }
 0x13e   :  { %2545 = vmatprep.subr.bf16.mxu0 %v2988_v37  ;;  %v467_v17 = vpack.c.bf16 %v369_v6, %v369_v6  ;;  %v373_v23 = vadd.f32 %v372_v4, %v3136_v47  ;;  %v2520_v36 = vpop.f32.mrf.mxu1 }
 0x13f   :  { %v374_v8 = vpop.f32.mrf.mxu0  ;;  %v984_v41 = vpack.c.bf16 %v442_v29, %v442_v29  ;;  %v453_v44 = vadd.f32 %v2520_v36, %v3143_v57  ;;  %v3176_v50 = vsel %vm991_vm1, %v986_v33, 0 }
 0x140   :  { %v375_v10 = vadd.f32 %v374_v8, %v3129_v42  ;;  %v460_v46 = vpack.c.bf16 %v373_v23, %v373_v23  ;;  %v444_v51 = vpop.f32.mrf.mxu1  ;;  %v981_v8 = vpack.c.bf16 %v429_v5, %v429_v5 }
 0x141   :  { %v376_v14 = vpop.f32.mrf.mxu0  ;;  %v3179_v54 = vsel %vm991_vm1, %v984_v41, 0  ;;  %v987_v55 = vpack.c.bf16 %v453_v44, %v453_v44  ;;  %v445_v58 = vadd.f32 %v444_v51, %v3143_v57 }
 0x142   :  { %v468_v18 = vpack.c.bf16 %v375_v10, %v375_v10  ;;  %v377_v60 = vadd.f32 %v376_v14, %v3136_v47  ;;  %v1039_v9 = vsel %vm991_vm1, %v981_v8, 0  ;;  %v472_v14 = vld [vmem:[#allocation5] sm:$0xff] }
 0x143   :  { %v378_v19 = vpop.f32.mrf.mxu0  ;;  %2530 = vmatmul.mubr.bf16.vlgmr.msra.gmra.mxu1 %v457_v12  ;;  %2536 = vmatmul.mubr.bf16.vlgmr.msra.gmra.mxu0 %v458_v13  ;;  %v3183_v59 = vsel %vm991_vm1, %v987_v55, 0  ;;  %v985_v62 = vpack.c.bf16 %v445_v58, %v445_v58  ;;  %v474_v23 = vcombine.high %v472_v14, %v472_v14 }
 0x144   :  { %2540 = vmatpush3.bf16.xpose.msra.mxu1 %v467_v17  ;;  %2546 = vmatpush3.bf16.xpose.msra.mxu0 %v468_v18  ;;  %v379_v28 = vadd.f32 %v378_v19, %v3129_v42  ;;  %v461_v3 = vpack.c.bf16 %v377_v60, %v377_v60 }
 0x145   :  { %v382_v24 = vpop.f32.mrf.mxu0  ;;  %2541 = vmatprep.mubr.msk.bf16.mxu1 %vm2989_vm0, %v2988_v37  ;;  %2547 = vmatprep.mubr.msk.bf16.mxu0 %vm2989_vm0, %v2988_v37  ;;  %v3195_v2 = vsel %vm991_vm1, %v985_v62, 0 }
 0x146   :  { %2551 = vmatprep.subr.bf16.mxu1 %v2988_v37  ;;  %2557 = vmatprep.subr.bf16.mxu0 %v2988_v37  ;;  %v469_v52 = vpack.c.bf16 %v379_v28, %v379_v28  ;;  %v383_v61 = vadd.f32 %v382_v24, %v3136_v47 }
 0x147   :  { %v384_v30 = vpop.f32.mrf.mxu0 }
 0x148   :  { %v385_v38 = vadd.f32 %v384_v30, %v3129_v42  ;;  %v462_v4 = vpack.c.bf16 %v383_v61, %v383_v61 }
 0x149   :  { %v386_v48 = vpop.f32.mrf.mxu0 }
 0x14a   :  { %v470_v53 = vpack.c.bf16 %v385_v38, %v385_v38 }
 0x14b   :  { %2542 = vmatmul.mubr.bf16.vlgmr.msra.gmra.mxu1 %v459_v45  ;;  %2548 = vmatmul.mubr.bf16.vlgmr.msra.gmra.mxu0 %v460_v46  ;;  %v388_v56 = vpop.f32.mrf.mxu0 }
 0x14c   :  { %2552 = vmatpush3.bf16.xpose.msra.mxu1 %v469_v52  ;;  %2558 = vmatpush3.bf16.xpose.msra.mxu0 %v470_v53  ;;  %v389_v63 = vadd.f32 %v388_v56, %v3129_v42  ;;  %v387_v42 = vadd.f32 %v386_v48, %v3136_v47  ;;  %v2990_v47 = vmov 1966171168  }
 0x14d   :  { %2553 = vmatprep.mubr.msk.bf16.mxu1 %vm2989_vm0, %v2988_v37  ;;  %2559 = vmatprep.mubr.msk.bf16.mxu0 %vm2989_vm0, %v2988_v37  ;;  %v476_v10 = vunpack.c.l.s4 %v2990_v47 }
 0x14e   :  { %2563 = vmatprep.subr.bf16.mxu1 %v2988_v37  ;;  %2569 = vmatprep.subr.bf16.mxu0 %v2988_v37  ;;  %v471_v6 = vpack.c.bf16 %v389_v63, %v389_v63  ;;  %v463_v57 = vpack.c.bf16 %v387_v42, %v387_v42 }
 0x14f   :  { %v477_v12 = vunpack.c.0.s8 %v476_v10 }
 0x151   :  { %v480_v13 = vsub.s32 %v477_v12, %v3121_v39 }
 0x153   :  { %2554 = vmatmul.mubr.bf16.vlgmr.msra.gmra.mxu1 %v461_v3  ;;  %2560 = vmatmul.mubr.bf16.vlgmr.msra.gmra.mxu0 %v462_v4  ;;  %v481_v15 = vrot.slane %v472_v14, %v480_v13  ;;  %v488_v30 = vrot.slane %v474_v23, %v480_v13 }
 0x154   :  { %2564 = vmatpush3.bf16.xpose.msra.mxu1 %v471_v6  ;;  %2565 = vmatprep.mubr.msk.bf16.mxu1 %vm2989_vm0, %v2988_v37 }
 0x155   :  { %2575 = vmatprep.subr.bf16.mxu1 %v2988_v37  ;;  %2570 = vmatpush3.bf16.msra.mxu0 %v993_v7  ;;  %v497_v16 = vrot.slane %v481_v15, %v480_v13  ;;  %v489_v18 = vcombine.high %v481_v15, %v481_v15  ;;  %v504_v46 = vrot.slane %v488_v30, %v480_v13 }
 0x156   :  { %2571 = vmatprep.mubr.msk.bf16.mxu0 %vm2989_vm0, %v2988_v37  ;;  %2581 = vmatprep.subr.bf16.mxu0 %v2988_v37  ;;  %v490_v60 = vcombine.high %v488_v30, %v488_v30 }
 0x157   :  { %v526_v17 = vrot.slane %v497_v16, %v3132_v43  ;;  %v511_v21 = vrot.slane %v489_v18, %v480_v13  ;;  %v519_v22 = vcombine.high %v497_v16, %v497_v16  ;;  %v542_v58 = vrot.slane %v504_v46, %v3132_v43 }
 0x158   :  { %v518_v5 = vrot.slane %v490_v60, %v480_v13  ;;  %v520_v6 = vcombine.high %v504_v46, %v504_v46 }
 0x159   :  { %v530_v28 = vrot.slane %v511_v21, %v3132_v43  ;;  %v534_v29 = vrot.slane %v519_v22, %v3132_v43  ;;  %v521_v45 = vcombine.high %v511_v21, %v511_v21 }
 0x15a   :  { %v546_v10 = vrot.slane %v518_v5, %v3132_v43  ;;  %v550_v12 = vrot.slane %v520_v6, %v3132_v43 }
 0x15b   :  { %2566 = vmatmul.mubr.bf16.vlgmr.msra.gmra.mxu1 %v463_v57  ;;  %v538_v56 = vrot.slane %v521_v45, %v3132_v43 }
 0x15c   :  { %2576 = vmatpush3.bf16.msra.mxu1 %v1039_v9  ;;  %2577 = vmatprep.mubr.msk.bf16.mxu1 %vm2989_vm0, %v2988_v37 }
 0x15d   :  { %2587 = vmatprep.subr.bf16.mxu1 %v2988_v37 }
 0x1fb   :  { %v597_v19 = vpop.f32.mrf.mxu1 }
 0x1fc   :  { %v3212_v20 = vadd.f32 %v597_v19, %v526_v17  ;;  %v522_v19 = vcombine.high %v518_v5, %v518_v5 }
 0x1fd   :  { %v2525_v24 = vpop.f32.mrf.mxu1 }
 0x1fe   :  { %v884_v26 = vsel %vm883_vm2, %v3212_v20, -inf }
 0x1ff   :  { %885 = vmax.xlane.f32.xlu0 %v884_v26  ;;  %v600_v27 = vpop.f32.mrf.mxu1 }
 0x201   :  { %v2526_v33 = vpop.f32.mrf.mxu1 }
 0x203   :  { %v637_v36 = vpop.f32.mrf.mxu1  ;;  %v677_v38 = vpop.f32.mrf.mxu0 }
 0x204   :  { %v3218_v41 = vadd.f32 %v637_v36, %v530_v28  ;;  %v3220_v44 = vadd.f32 %v677_v38, %v534_v29  ;;  %v554_v28 = vrot.slane %v522_v19, %v3132_v43 }
 0x205   :  { %v2531_v48 = vpop.f32.mrf.mxu1  ;;  %v2537_v49 = vpop.f32.mrf.mxu0 }
 0x206   :  { %v890_v51 = vsel %vm883_vm2, %v3220_v44, -inf  ;;  %v887_v52 = vsel %vm883_vm2, %v3218_v41, -inf }
 0x207   :  { %891 = vmax.xlane.f32.xlu1 %v890_v51  ;;  %v680_v53 = vpop.f32.mrf.mxu0  ;;  %888 = vmax.xlane.f32.xlu0 %v887_v52  ;;  %v640_v55 = vpop.f32.mrf.mxu1 }
 0x209   :  { %v2532_v61 = vpop.f32.mrf.mxu1  ;;  %v2538_v62 = vpop.f32.mrf.mxu0 }
 0x20b   :  { %v717_v63 = vpop.f32.mrf.mxu1  ;;  %v757_v1 = vpop.f32.mrf.mxu0 }
 0x20c   :  { %v718_v3 = vadd.f32 %v717_v63, %v538_v56  ;;  %v758_v4 = vadd.f32 %v757_v1, %v542_v58 }
 0x20d   :  { %v2543_v7 = vpop.f32.mrf.mxu1  ;;  %v2549_v42 = vpop.f32.mrf.mxu0 }
 0x20e   :  { %v896_v8 = vsel %vm883_vm2, %v758_v4, -inf  ;;  %v893_v57 = vsel %vm883_vm2, %v718_v3, -inf }
 0x20f   :  { %v760_v9 = vpop.f32.mrf.mxu0  ;;  %897 = vmax.xlane.f32.xlu0 %v896_v8  ;;  %894 = vmax.xlane.f32.xlu1 %v893_v57  ;;  %v720_v47 = vpop.f32.mrf.mxu1 }
 0x211   :  { %v2544_v14 = vpop.f32.mrf.mxu1  ;;  %v2550_v15 = vpop.f32.mrf.mxu0 }
 0x213   :  { %v797_v16 = vpop.f32.mrf.mxu1  ;;  %v837_v17 = vpop.f32.mrf.mxu0 }
 0x214   :  { %v798_v13 = vadd.f32 %v797_v16, %v546_v10  ;;  %v838_v18 = vadd.f32 %v837_v17, %v550_v12 }
 0x215   :  { %v2555_v21 = vpop.f32.mrf.mxu1  ;;  %v2561_v22 = vpop.f32.mrf.mxu0 }
 0x216   :  { %v902_v23 = vsel %vm883_vm2, %v838_v18, -inf  ;;  %v899_v24 = vsel %vm883_vm2, %v798_v13, -inf }
 0x217   :  { %903 = vmax.xlane.f32.xlu0 %v902_v23  ;;  %900 = vmax.xlane.f32.xlu1 %v899_v24  ;;  %v800_v26 = vpop.f32.mrf.mxu1  ;;  %v840_v27 = vpop.f32.mrf.mxu0 }
 0x219   :  { %v2556_v29 = vpop.f32.mrf.mxu1  ;;  %v2562_v30 = vpop.f32.mrf.mxu0 }
 0x21b   :  { %v877_v33 = vpop.f32.mrf.mxu1 }
 0x21c   :  { %v878_v36 = vadd.f32 %v877_v33, %v554_v28 }
 0x21d   :  { %v2567_v38 = vpop.f32.mrf.mxu1 }
 0x21e   :  { %v905_v45 = vsel %vm883_vm2, %v878_v36, -inf }
 0x21f   :  { %906 = vmax.xlane.f32.xlu1 %v905_v45  ;;  %v880_v46 = vpop.f32.mrf.mxu1 }
 0x221   :  { %v2568_v48 = vpop.f32.mrf.mxu1 }
 0x288   :  { %v886_v49 = vpop.xlane.xlu0 %885 }
 0x289   :  { %v908_v51 = vsub.f32 %v3212_v20, %v886_v49 }
 0x28b   :  { %v916_v52 = vmul.f32 1.442695, %v908_v51 }
 0x28d   :  { %2757 = vpow2.f32 %v916_v52 }
 0x290   :  { %v892_v53 = vpop.xlane.xlu1 %891  ;;  %v889_v55 = vpop.xlane.xlu0 %888 }
 0x291   :  { %v910_v56 = vsub.f32 %v3220_v44, %v892_v53  ;;  %v909_v58 = vsub.f32 %v3218_v41, %v889_v55 }
 0x293   :  { %v920_v60 = vmul.f32 1.442695, %v910_v56  ;;  %v918_v61 = vmul.f32 1.442695, %v909_v58 }
 0x295   :  { %2759 = vpow2.f32 %v920_v60 }
 0x296   :  { %2761 = vpow2.f32 %v918_v61 }
 0x298   :  { %v898_v62 = vpop.xlane.xlu0 %897  ;;  %v895_v63 = vpop.xlane.xlu1 %894 }
 0x299   :  { %v912_v1 = vsub.f32 %v758_v4, %v898_v62  ;;  %v911_v5 = vsub.f32 %v718_v3, %v895_v63 }
 0x29a   :  { %v2758_v6 = vpop.eup %2757 }
 0x29b   :  { %v924_v7 = vmul.f32 1.442695, %v912_v1  ;;  %v922_v42 = vmul.f32 1.442695, %v911_v5  ;;  %v932_v20 = vsel %vm883_vm2, %v2758_v6, 0.0 }
 0x29c   :  { %933 = vadd.xlane.f32.xlu0 %v932_v20 }
 0x29d   :  { %2763 = vpow2.f32 %v924_v7 }
 0x29e   :  { %2765 = vpow2.f32 %v922_v42 }
 0x2a0   :  { %v904_v8 = vpop.xlane.xlu0 %903  ;;  %v901_v44 = vpop.xlane.xlu1 %900 }
 0x2a1   :  { %v914_v57 = vsub.f32 %v838_v18, %v904_v8  ;;  %v913_v41 = vsub.f32 %v798_v13, %v901_v44  ;;  %v2710_v44 = vld [vmem:[#allocation8 + $0x30] sm:$0xff]  }
 0x2a2   :  { %v2760_v9 = vpop.eup %2759 }
 0x2a3   :  { %v2762_v47 = vpop.eup %2761  ;;  %v928_v10 = vmul.f32 1.442695, %v914_v57  ;;  %v926_v12 = vmul.f32 1.442695, %v913_v41  ;;  %v938_v14 = vsel %vm883_vm2, %v2760_v9, 0.0 }
 0x2a4   :  { %939 = vadd.xlane.f32.xlu0 %v938_v14  ;;  %v935_v3 = vsel %vm883_vm2, %v2762_v47, 0.0 }
 0x2a5   :  { %2767 = vpow2.f32 %v928_v10  ;;  %936 = vadd.xlane.f32.xlu1 %v935_v3  ;;  %v2716_v10 = vld [vmem:[#allocation8] sm:$0xff]  }
 0x2a6   :  { %2769 = vpow2.f32 %v926_v12 }
 0x2a8   :  { %v907_v4 = vpop.xlane.xlu1 %906 }
 0x2a9   :  { %v915_v15 = vsub.f32 %v878_v36, %v907_v4 }
 0x2aa   :  { %v2764_v16 = vpop.eup %2763 }
 0x2ab   :  { %v2766_v17 = vpop.eup %2765  ;;  %v930_v19 = vmul.f32 1.442695, %v915_v15  ;;  %v944_v18 = vsel %vm883_vm2, %v2764_v16, 0.0 }
 0x2ac   :  { %945 = vadd.xlane.f32.xlu0 %v944_v18  ;;  %v941_v13 = vsel %vm883_vm2, %v2766_v17, 0.0 }
 0x2ad   :  { %2771 = vpow2.f32 %v930_v19  ;;  %942 = vadd.xlane.f32.xlu1 %v941_v13 }
 0x2b2   :  { %v2768_v21 = vpop.eup %2767 }
 0x2b3   :  { %v3244_v22 = vpop.eup %2769  ;;  %v950_v23 = vsel %vm883_vm2, %v2768_v21, 0.0 }
 0x2b4   :  { %951 = vadd.xlane.f32.xlu0 %v950_v23  ;;  %v947_v24 = vsel %vm883_vm2, %v3244_v22, 0.0 }
 0x2b5   :  { %948 = vadd.xlane.f32.xlu1 %v947_v24 }
 0x2ba   :  { %v3249_v26 = vpop.eup %2771 }
 0x2bb   :  { %v953_v27 = vsel %vm883_vm2, %v3249_v26, 0.0 }
 0x2bc   :  { %954 = vadd.xlane.f32.xlu1 %v953_v27 }
 0x325   :  { %v934_v28 = vpop.xlane.xlu0 %933 }
 0x326   :  { %2773 = vrcp.f32 %v934_v28 }
 0x32d   :  { %v940_v29 = vpop.xlane.xlu0 %939 }
 0x32e   :  { %2775 = vrcp.f32 %v940_v29  ;;  %v937_v30 = vpop.xlane.xlu1 %936 }
 0x32f   :  { %2777 = vrcp.f32 %v937_v30 }
 0x333   :  { %v2774_v33 = vpop.eup %2773 }
 0x334   :  { %v964_v36 = vmul.f32 %v2774_v33, %v2758_v6 }
 0x335   :  { %v946_v38 = vpop.xlane.xlu0 %945 }
 0x336   :  { %2779 = vrcp.f32 %v946_v38  ;;  %v943_v45 = vpop.xlane.xlu1 %942  ;;  %v972_v46 = vpack.c.bf16 %v964_v36, %v964_v36 }
 0x337   :  { %2781 = vrcp.f32 %v943_v45 }
 0x338   :  { %2572 = vmatmul.mubr.msk.bf16.vlgmr.msra.gmra.mxu0 %vm883_vm2, %v972_v46 }
 0x339   :  { %2582 = vmatpush3.bf16.msra.mxu0 %v3155_v11  ;;  %2583 = vmatprep.mubr.msk.bf16.mxu0 %vm2989_vm0, %v2988_v37 }
 0x33a   :  { %2593 = vmatprep.subr.bf16.mxu0 %v2988_v37 }
 0x33b   :  { %v2776_v48 = vpop.eup %2775 }
 0x33c   :  { %v2778_v49 = vpop.eup %2777  ;;  %v966_v51 = vmul.f32 %v2776_v48, %v2760_v9  ;;  %v2712_v9 = vld [vmem:[#allocation8 + $0x20] sm:$0xff]  }
 0x33d   :  { %v952_v52 = vpop.xlane.xlu0 %951  ;;  %v965_v53 = vmul.f32 %v2778_v49, %v2762_v47  ;;  %v2715_v47 = vld [vmem:[#allocation8 + $0x8] sm:$0xff]  }
 0x33e   :  { %2783 = vrcp.f32 %v952_v52  ;;  %v949_v55 = vpop.xlane.xlu1 %948  ;;  %v974_v56 = vpack.c.bf16 %v966_v51, %v966_v51 }
 0x33f   :  { %2785 = vrcp.f32 %v949_v55  ;;  %v973_v58 = vpack.c.bf16 %v965_v53, %v965_v53 }
 0x340   :  { %2584 = vmatmul.mubr.msk.bf16.vlgmr.msra.gmra.mxu0 %vm883_vm2, %v974_v56 }
 0x341   :  { %2578 = vmatmul.mubr.msk.bf16.vlgmr.msra.gmra.mxu1 %vm883_vm2, %v973_v58  ;;  %2594 = vmatpush3.bf16.msra.mxu0 %v3179_v54 }
 0x342   :  { %2588 = vmatpush3.bf16.msra.mxu1 %v3165_v25  ;;  %2589 = vmatprep.mubr.msk.bf16.mxu1 %vm2989_vm0, %v2988_v37  ;;  %v2709_v25 = vld [vmem:[#allocation8 + $0x38] sm:$0xff]  }
 0x343   :  { %v2780_v11 = vpop.eup %2779  ;;  %2595 = vmatprep.mubr.msk.bf16.mxu0 %vm2989_vm0, %v2988_v37  ;;  %2599 = vmatprep.subr.bf16.mxu1 %v2988_v37 }
 0x344   :  { %v2782_v60 = vpop.eup %2781  ;;  %2605 = vmatprep.subr.bf16.mxu0 %v2988_v37  ;;  %v968_v61 = vmul.f32 %v2780_v11, %v2764_v16 }
 0x345   :  { %v955_v62 = vpop.xlane.xlu1 %954  ;;  %v967_v63 = vmul.f32 %v2782_v60, %v2766_v17 }
 0x346   :  { %2787 = vrcp.f32 %v955_v62  ;;  %v976_v1 = vpack.c.bf16 %v968_v61, %v968_v61 }
 0x347   :  { %v975_v54 = vpack.c.bf16 %v967_v63, %v967_v63 }
 0x348   :  { %2596 = vmatmul.mubr.msk.bf16.vlgmr.msra.gmra.mxu0 %vm883_vm2, %v976_v1 }
 0x349   :  { %2590 = vmatmul.mubr.msk.bf16.vlgmr.msra.gmra.mxu1 %vm883_vm2, %v975_v54  ;;  %2606 = vmatpush3.bf16.msra.mxu0 %v3176_v50  ;;  %v2711_v50 = vld [vmem:[#allocation8 + $0x28] sm:$0xff]  }
 0x34a   :  { %2600 = vmatpush3.bf16.msra.mxu1 %v3195_v2  ;;  %2601 = vmatprep.mubr.msk.bf16.mxu1 %vm2989_vm0, %v2988_v37 }
 0x34b   :  { %v2784_v5 = vpop.eup %2783  ;;  %2607 = vmatprep.mubr.msk.bf16.mxu0 %vm2989_vm0, %v2988_v37  ;;  %2611 = vmatprep.subr.bf16.mxu1 %v2988_v37 }
 0x34c   :  { %v2786_v6 = vpop.eup %2785  ;;  %v970_v7 = vmul.f32 %v2784_v5, %v2768_v21  ;;  %2617 = vmatprep.subr.bf16.mxu0 %v2709_v25  ;;  %v2991_v5 = vmov 1983009808  }
 0x34d   :  { %v969_v42 = vmul.f32 %v2786_v6, %v3244_v22  ;;  %v1500_v6 = vunpack.c.l.s4 %v2991_v5 }
 0x34e   :  { %v978_v20 = vpack.c.bf16 %v970_v7, %v970_v7  ;;  %v2355_v7 = vld [vmem:[%s3473_s5] ss:$0 sm:$0xff] }
 0x34f   :  { %v977_v8 = vpack.c.bf16 %v969_v42, %v969_v42 }
 0x350   :  { %2608 = vmatmul.mubr.msk.bf16.vlgmr.msra.gmra.mxu0 %vm883_vm2, %v978_v20 }
 0x351   :  { %2602 = vmatmul.mubr.msk.bf16.vlgmr.msra.gmra.mxu1 %vm883_vm2, %v977_v8  ;;  %2618 = vmatpush3.bf16.msra.mxu0 %v2709_v25 }
 0x352   :  { %2612 = vmatpush3.bf16.msra.mxu1 %v3183_v59  ;;  %2613 = vmatprep.mubr.msk.bf16.mxu1 %vm2989_vm0, %v2988_v37  ;;  %v2713_v59 = vld [vmem:[#allocation8 + $0x18] sm:$0xff]   ;;  %v2714_v37 = vld [vmem:[#allocation8 + $0x10] sm:$0xff]  }
 0x353   :  { %v2788_v2 = vpop.eup %2787  ;;  %2619 = vmatprep.subr.bf16.mxu0 %v2710_v44 }
 0x354   :  { %v971_v57 = vmul.f32 %v2788_v2, %v3249_v26 }
 0x355   :  { %2620 = vmatpush3.bf16.msra.mxu0 %v2710_v44  ;;  %v1501_v44 = vunpack.c.0.s8 %v1500_v6 }
 0x356   :  { %v979_v41 = vpack.c.bf16 %v971_v57, %v971_v57  ;;  %2621 = vmatprep.subr.bf16.mxu0 %v2711_v50  ;;  %v2992_v57 = vmov 1934713408  }
 0x359   :  { %2614 = vmatmul.mubr.msk.bf16.vlgmr.msra.gmra.mxu1 %vm883_vm2, %v979_v41  ;;  %2622 = vmatpush3.bf16.msra.mxu0 %v2711_v50  ;;  %v1564_v41 = vunpack.c.l.s4 %v2992_v57 }
 0x35a   :  { %2623 = vmatprep.subr.bf16.mxu0 %v2712_v9  ;;  %1904 = vmatprep.mubr.bf16.mxu1 %v2987_v0 }
 0x35d   :  { %2624 = vmatpush3.bf16.msra.mxu0 %v2712_v9 }
 0x35e   :  { %2625 = vmatprep.subr.bf16.mxu0 %v2713_v59 }
 0x361   :  { %2626 = vmatpush3.bf16.msra.mxu0 %v2713_v59 }
 0x362   :  { %2627 = vmatprep.subr.bf16.mxu0 %v2714_v37 }
 0x365   :  { %2628 = vmatpush3.bf16.msra.mxu0 %v2714_v37 }
 0x366   :  { %2629 = vmatprep.subr.bf16.mxu0 %v2715_v47 }
 0x369   :  { %2630 = vmatpush3.bf16.msra.mxu0 %v2715_v47 }
 0x36a   :  { %2631 = vmatprep.subr.bf16.mxu0 %v2716_v10 }
 0x36d   :  { %2632 = vmatpush3.bf16.msra.mxu0 %v2716_v10 }
 0x3f8   :  { %v1029_v12 = vpop.f32.mrf.mxu0 }
 0x3fa   :  { %v2573_v14 = vpop.f32.mrf.mxu0 }
 0x3fc   :  { %v1032_v3 = vpop.f32.mrf.mxu0 }
 0x3fe   :  { %v2574_v4 = vpop.f32.mrf.mxu0 }
 0x3ff   :  { %v1565_v4 = vunpack.c.0.s8 %v1564_v41 }
 0x400   :  { %v1121_v15 = vpop.f32.mrf.mxu0 }
 0x401   :  { %v1075_v16 = vpop.f32.mrf.mxu1 }
 0x402   :  { %v1357_v17 = vpack.c.bf16 %v1075_v16, %v1029_v12  ;;  %v2585_v19 = vpop.f32.mrf.mxu0  ;;  %v1504_v12 = vsub.s32 %v1501_v44, %v3121_v39  ;;  %v2824_v44 = vld [vmem:[#allocation2 + $0x10] sm:$0xff] }
 0x403   :  { %v2579_v18 = vpop.f32.mrf.mxu1 }
 0x404   :  { %2633 = vmatprep.mubr.bf16.mxu0 %v1357_v17  ;;  %v1124_v13 = vpop.f32.mrf.mxu0 }
 0x405   :  { %v1078_v21 = vpop.f32.mrf.mxu1 }
 0x406   :  { %v2586_v22 = vpop.f32.mrf.mxu0 }
 0x407   :  { %v2580_v23 = vpop.f32.mrf.mxu1 }
 0x408   :  { %v1213_v24 = vpop.f32.mrf.mxu0 }
 0x409   :  { %v1167_v26 = vpop.f32.mrf.mxu1 }
 0x40a   :  { %v1358_v27 = vpack.c.bf16 %v1167_v26, %v1121_v15  ;;  %v2597_v28 = vpop.f32.mrf.mxu0  ;;  %v1568_v26 = vsub.s32 %v1565_v4, %v3121_v39  ;;  %v2722_v4 = vld [vmem:[#allocation10 + $0x64] ss:$8 sps:$4 sm:$0xff]  }
 0x40b   :  { %v2591_v29 = vpop.f32.mrf.mxu1 }
 0x40c   :  { %2634 = vmatmul.mubr.bf16.vlgmr.msra.gmra.mxu0 %v1358_v27  ;;  %v1216_v30 = vpop.f32.mrf.mxu0 }
 0x40d   :  { %v1170_v33 = vpop.f32.mrf.mxu1 }
 0x40e   :  { %v2598_v36 = vpop.f32.mrf.mxu0 }
 0x40f   :  { %v2592_v38 = vpop.f32.mrf.mxu1 }
 0x410   :  { %v1305_v45 = vpop.f32.mrf.mxu0 }
 0x411   :  { %v1259_v46 = vpop.f32.mrf.mxu1 }
 0x412   :  { %v1359_v48 = vpack.c.bf16 %v1259_v46, %v1213_v24  ;;  %v2609_v49 = vpop.f32.mrf.mxu0 }
 0x413   :  { %v2603_v51 = vpop.f32.mrf.mxu1 }
 0x414   :  { %2637 = vmatprep.mubr.bf16.mxu0 %v1359_v48  ;;  %v1308_v52 = vpop.f32.mrf.mxu0 }
 0x415   :  { %v1262_v53 = vpop.f32.mrf.mxu1 }
 0x416   :  { %v2610_v55 = vpop.f32.mrf.mxu0 }
 0x417   :  { %v2604_v56 = vpop.f32.mrf.mxu1 }
 0x419   :  { %v1351_v58 = vpop.f32.mrf.mxu1 }
 0x41a   :  { %v1360_v11 = vpack.c.bf16 %v1351_v58, %v1305_v45 }
 0x41b   :  { %v2615_v60 = vpop.f32.mrf.mxu1 }
 0x41c   :  { %2638 = vmatmul.mubr.bf16.gmra.mxu0 %v1360_v11 }
 0x41d   :  { %v1354_v61 = vpop.f32.mrf.mxu1 }
 0x41f   :  { %v2616_v62 = vpop.f32.mrf.mxu1 }
 0x420   :  { %v2821_v62 = vld [vmem:[#allocation2 + $0x8] sm:$0xff] }
 0x4cc   :  { %v2635_v63 = vpop.f32.mrf.mxu0 }
 0x4cd   :  { %v1475_v9 = vadd.f32 %v2635_v63, %v2355_v7 }
 0x4ce   :  { %v1466_v1 = vpop.f32.mrf.mxu0 }
 0x4cf   :  { %v1467_v8 = vadd.f32 %v2355_v7, %v1466_v1  ;;  %v2822_v1 = vld [vmem:[#allocation2] sm:$0xff] }
 0x4d0   :  { %v2636_v54 = vpop.f32.mrf.mxu0 }
 0x4d1   :  { %v1478_v50 = vadd.f32 %v2636_v54, %v2355_v7  ;;  %v1497_v10 = vcombine.low %v1467_v8, %v1475_v9  ;;  %v1498_v24 = vcombine.high %v1467_v8, %v1475_v9 }
 0x4d2   :  { %v1469_v25 = vpop.f32.mrf.mxu0 }
 0x4d3   :  { %v1470_v42 = vadd.f32 %v2355_v7, %v1469_v25  ;;  %v1505_v13 = vrot.slane %v1497_v10, %v1504_v12  ;;  %v1512_v49 = vrot.slane %v1498_v24, %v1504_v12 }
 0x4d5   :  { %v1513_v59 = vcombine.low %v1470_v42, %v1478_v50  ;;  %v1514_v21 = vcombine.high %v1470_v42, %v1478_v50 }
 0x4d7   :  { %v1521_v15 = vrot.slane %v1513_v59, %v1504_v12  ;;  %v1528_v36 = vrot.slane %v1514_v21, %v1504_v12 }
 0x4d9   :  { %v1561_v27 = vcombine.low %v1505_v13, %v1521_v15  ;;  %v1562_v38 = vcombine.high %v1505_v13, %v1521_v15  ;;  %v1577_v55 = vcombine.low %v1512_v49, %v1528_v36  ;;  %v1578_v6 = vcombine.high %v1512_v49, %v1528_v36  ;;  %v2720_v15 = vld [vmem:[#allocation10 + $0x60] ss:$8 sps:$4 sm:$0xff]  }
 0x4db   :  { %v1569_v51 = vrot.slane %v1561_v27, %v1568_v26  ;;  %v1576_v11 = vrot.slane %v1562_v38, %v1568_v26  ;;  %v1592_v41 = vrot.slane %v1578_v6, %v1568_v26  ;;  %v2735_v6 = vld [vmem:[#allocation10 + $0x10] ss:$8 sps:$4 sm:$0xff]  }
 0x4dc   :  { %v2639_v20 = vpop.f32.mrf.mxu0 }
 0x4dd   :  { %v1491_v14 = vadd.f32 %v2639_v20, %v2355_v7  ;;  %v2823_v20 = vld [vmem:[#allocation2 + $0x18] sm:$0xff] }
 0x4de   :  { %v1482_v2 = vpop.f32.mrf.mxu0 }
 0x4df   :  { %v1483_v37 = vadd.f32 %v2355_v7, %v1482_v2 }
 0x4e0   :  { %v2640_v47 = vpop.f32.mrf.mxu0 }
 0x4e1   :  { %v1529_v16 = vcombine.low %v1483_v37, %v1491_v14  ;;  %v1494_v17 = vadd.f32 %v2640_v47, %v2355_v7  ;;  %v1530_v18 = vcombine.high %v1483_v37, %v1491_v14  ;;  %v2717_v14 = vld [vmem:[#allocation10 + $0x70] ss:$8 sps:$4 sm:$0xff]  }
 0x4e2   :  { %v1485_v3 = vpop.f32.mrf.mxu0 }
 0x4e3   :  { %v1486_v19 = vadd.f32 %v2355_v7, %v1485_v3  ;;  %v1537_v28 = vrot.slane %v1529_v16, %v1504_v12  ;;  %v1544_v33 = vrot.slane %v1530_v18, %v1504_v12  ;;  %v1585_v7 = vrot.slane %v1577_v55, %v1568_v26  ;;  %v2719_v3 = vld [vmem:[#allocation10 + $0x74] ss:$8 sps:$4 sm:$0xff]  }
 0x4e4   :  { %1872 = vmatprep.subr.bf16.mxu1 %v2719_v3 }
 0x4e5   :  { %v1545_v22 = vcombine.low %v1486_v19, %v1494_v17  ;;  %v1546_v23 = vcombine.high %v1486_v19, %v1494_v17  ;;  %1873 = vmatpush1.bf16.msra.mxu1 %v2717_v14 }
 0x4e6   :  { %1874 = vmatprep.subr.bf16.mxu1 %v2722_v4 }
 0x4e7   :  { %v1553_v29 = vrot.slane %v1545_v22, %v1504_v12  ;;  %v1560_v30 = vrot.slane %v1546_v23, %v1504_v12 }
 0x4e9   :  { %v1593_v45 = vcombine.low %v1537_v28, %v1553_v29  ;;  %v1594_v46 = vcombine.high %v1537_v28, %v1553_v29  ;;  %v1609_v48 = vcombine.low %v1544_v33, %v1560_v30  ;;  %v1610_v60 = vcombine.high %v1544_v33, %v1560_v30  ;;  %1875 = vmatpush1.bf16.msra.mxu1 %v2720_v15 }
 0x4eb   :  { %v1601_v52 = vrot.slane %v1593_v45, %v1568_v26  ;;  %v1608_v53 = vrot.slane %v1594_v46, %v1568_v26  ;;  %v1617_v61 = vrot.slane %v1609_v48, %v1568_v26  ;;  %v1624_v42 = vrot.slane %v1610_v60, %v1568_v26  ;;  %v2725_v60 = vld [vmem:[#allocation10 + $0x54] ss:$8 sps:$4 sm:$0xff]  }
 0x4ec   :  { %1876 = vmatprep.subr.bf16.mxu1 %v2725_v60 }
 0x4ed   :  { %v1626_v56 = vcombine.high %v1569_v51, %v1601_v52  ;;  %v1625_v58 = vcombine.low %v1569_v51, %v1601_v52  ;;  %v1628_v25 = vcombine.high %v1576_v11, %v1608_v53  ;;  %v1627_v5 = vcombine.low %v1576_v11, %v1608_v53 }
 0x4ee   :  { %v1630_v2 = vcombine.high %v1585_v7, %v1617_v61  ;;  %v1629_v57 = vcombine.low %v1585_v7, %v1617_v61  ;;  %v1632_v37 = vcombine.high %v1592_v41, %v1624_v42  ;;  %v1631_v47 = vcombine.low %v1592_v41, %v1624_v42  ;;  %v2723_v61 = vld [vmem:[#allocation10 + $0x50] ss:$8 sps:$4 sm:$0xff]   ;;  %v2737_v7 = vld [vmem:[#allocation10 + $0x14] ss:$8 sps:$4 sm:$0xff]   ;;  %v2740_v42 = vld [vmem:[#allocation10 + $0x4] ss:$8 sps:$4 sm:$0xff]  }
 0x4ef   :  { %v1634_v63 = vadd.f32 %v2821_v62, %v1626_v56  ;;  %v1633_v54 = vadd.f32 %v2822_v1, %v1625_v58  ;;  %v1636_v8 = vadd.f32 %v2823_v20, %v1628_v25  ;;  %v1635_v50 = vadd.f32 %v2824_v44, %v1627_v5  ;;  %1877 = vmatpush1.bf16.msra.mxu1 %v2723_v61  ;;  %v2728_v62 = vld [vmem:[#allocation10 + $0x44] ss:$8 sps:$4 sm:$0xff]   ;;  %v2731_v1 = vld [vmem:[#allocation10 + $0x34] ss:$8 sps:$4 sm:$0xff]   ;;  %v2732_v5 = vld [vmem:[#allocation10 + $0x20] ss:$8 sps:$4 sm:$0xff]  }
 0x4f0   :  { %v1638_v9 = vadd.f32 %v1630_v2, %v3104_v32  ;;  %v1637_v59 = vadd.f32 %v1629_v57, %v3102_v31  ;;  %v1640_v10 = vadd.f32 %v1632_v37, %v3111_v35  ;;  %v1639_v12 = vadd.f32 %v1631_v47, %v3109_v34  ;;  %1878 = vmatprep.subr.bf16.mxu1 %v2728_v62  ;;  %v2734_v25 = vld [vmem:[#allocation10 + $0x24] ss:$8 sps:$4 sm:$0xff]   ;;  %v2738_v20 = vld [vmem:[#allocation10] ss:$8 sps:$4 sm:$0xff]   ;;  %v3327_v44 = vld [vmem:[#allocation11 + $0x38] sm:$0xff]  }
 0x4f1   :  { %1645 = vadd.xlane.f32.xlu1 %v1634_v63  ;;  %1643 = vadd.xlane.f32.xlu0 %v1633_v54  ;;  %v3332_v2 = vld [vmem:[#allocation11 + $0x30] sm:$0xff]   ;;  %v3335_v57 = vld [vmem:[#allocation11 + $0x68] sm:$0xff]   ;;  %v3347_v37 = vld [vmem:[#allocation11 + $0x58] sm:$0xff]  }
 0x4f2   :  { %v3338_v41 = vld [vmem:[#allocation11 + $0x28] sm:$0xff]   ;;  %v3350_v47 = vld [vmem:[#allocation11 + $0x18] sm:$0xff]  }
 0x4f5   :  { %1649 = vadd.xlane.f32.xlu1 %v1636_v8  ;;  %1647 = vadd.xlane.f32.xlu0 %v1635_v50 }
 0x4f9   :  { %1653 = vadd.xlane.f32.xlu1 %v1638_v9  ;;  %1651 = vadd.xlane.f32.xlu0 %v1637_v59 }
 0x4fd   :  { %1657 = vadd.xlane.f32.xlu1 %v1640_v10  ;;  %1655 = vadd.xlane.f32.xlu0 %v1639_v12 }
 0x57a   :  { %v1646_v32 = vpop.xlane.xlu1 %1645  ;;  %v1644_v31 = vpop.xlane.xlu0 %1643 }
 0x57b   :  { %v1661_v16 = vmul.f32 0.0078125, %v1646_v32  ;;  %v1660_v17 = vmul.f32 0.0078125, %v1644_v31 }
 0x57d   :  { %v3295_v19 = vsub.f32 %v1634_v63, %v1661_v16  ;;  %v3297_v18 = vsub.f32 %v1633_v54, %v1660_v17  ;;  %v2726_v63 = vld [vmem:[#allocation10 + $0x40] ss:$8 sps:$4 sm:$0xff]   ;;  %v2729_v54 = vld [vmem:[#allocation10 + $0x30] ss:$8 sps:$4 sm:$0xff]  }
 0x57e   :  { %v1650_v35 = vpop.xlane.xlu1 %1649  ;;  %v1648_v34 = vpop.xlane.xlu0 %1647  ;;  %1879 = vmatpush1.bf16.msra.mxu1 %v2726_v63 }
 0x57f   :  { %v1663_v13 = vmul.f32 0.0078125, %v1650_v35  ;;  %v1662_v21 = vmul.f32 0.0078125, %v1648_v34  ;;  %v1677_v22 = vmul.f32 %v3295_v19, %v3295_v19  ;;  %v1676_v23 = vmul.f32 %v3297_v18, %v3297_v18  ;;  %1880 = vmatprep.subr.bf16.mxu1 %v2731_v1 }
 0x581   :  { %v3303_v24 = vsub.f32 %v1636_v8, %v1663_v13  ;;  %v3305_v26 = vsub.f32 %v1635_v50, %v1662_v21  ;;  %1686 = vadd.xlane.f32.xlu1 %v1677_v22  ;;  %1684 = vadd.xlane.f32.xlu0 %v1676_v23  ;;  %v2741_v8 = vld [vmem:[#allocation11 + $0x78] sm:$0xff]   ;;  %v3329_v50 = vld [vmem:[#allocation11 + $0x70] sm:$0xff]  }
 0x582   :  { %v1654_v27 = vpop.xlane.xlu1 %1653  ;;  %v1652_v28 = vpop.xlane.xlu0 %1651  ;;  %1881 = vmatpush1.bf16.msra.mxu1 %v2729_v54  ;;  %2457 = vmatprep.subr.bf16.mxu0 %v2741_v8 }
 0x583   :  { %v1665_v29 = vmul.f32 0.0078125, %v1654_v27  ;;  %v1664_v30 = vmul.f32 0.0078125, %v1652_v28  ;;  %v1679_v33 = vmul.f32 %v3303_v24, %v3303_v24  ;;  %v1678_v36 = vmul.f32 %v3305_v26, %v3305_v26  ;;  %1882 = vmatprep.subr.bf16.mxu1 %v2734_v25  ;;  %2458 = vmatpush3.bf16.msra.mxu0 %v3327_v44 }
 0x584   :  { %2459 = vmatprep.subr.bf16.mxu0 %v3329_v50 }
 0x585   :  { %v3311_v38 = vsub.f32 %v1638_v9, %v1665_v29  ;;  %v3313_v45 = vsub.f32 %v1637_v59, %v1664_v30  ;;  %1690 = vadd.xlane.f32.xlu1 %v1679_v33  ;;  %1688 = vadd.xlane.f32.xlu0 %v1678_v36  ;;  %v3341_v9 = vld [vmem:[#allocation11 + $0x60] sm:$0xff]  }
 0x586   :  { %v1658_v46 = vpop.xlane.xlu1 %1657  ;;  %v1656_v48 = vpop.xlane.xlu0 %1655  ;;  %1883 = vmatpush1.bf16.msra.mxu1 %v2732_v5  ;;  %v3344_v59 = vld [vmem:[#allocation11 + $0x20] sm:$0xff]  }
 0x587   :  { %v1667_v49 = vmul.f32 0.0078125, %v1658_v46  ;;  %v1666_v51 = vmul.f32 0.0078125, %v1656_v48  ;;  %v1681_v52 = vmul.f32 %v3311_v38, %v3311_v38  ;;  %v1680_v53 = vmul.f32 %v3313_v45, %v3313_v45  ;;  %1884 = vmatprep.subr.bf16.mxu1 %v2737_v7  ;;  %2460 = vmatpush3.bf16.msra.mxu0 %v3332_v2 }
 0x588   :  { %2461 = vmatprep.subr.bf16.mxu0 %v3335_v57 }
 0x589   :  { %v3319_v55 = vsub.f32 %v1640_v10, %v1667_v49  ;;  %v3321_v56 = vsub.f32 %v1639_v12, %v1666_v51  ;;  %1694 = vadd.xlane.f32.xlu1 %v1681_v52  ;;  %1692 = vadd.xlane.f32.xlu0 %v1680_v53  ;;  %v2364_v51 = vld [vmem:[%s3474_s6] ss:$0 sm:$0xff] }
 0x58a   :  { %1885 = vmatpush1.bf16.msra.mxu1 %v2735_v6 }
 0x58b   :  { %v1683_v58 = vmul.f32 %v3319_v55, %v3319_v55  ;;  %v1682_v11 = vmul.f32 %v3321_v56, %v3321_v56  ;;  %1886 = vmatprep.subr.bf16.mxu1 %v2740_v42  ;;  %2462 = vmatpush3.bf16.msra.mxu0 %v3338_v41 }
 0x58c   :  { %2463 = vmatprep.subr.bf16.mxu0 %v3341_v9 }
 0x58d   :  { %1698 = vadd.xlane.f32.xlu1 %v1683_v58  ;;  %1696 = vadd.xlane.f32.xlu0 %v1682_v11  ;;  %v2365_v58 = vld [vmem:[%s3475_s7] ss:$0 sm:$0xff] }
 0x58e   :  { %1887 = vmatpush1.bf16.msra.mxu1 %v2738_v20 }
 0x58f   :  { %2641 = vmatprep.subr.bf16.mxu1 %v2741_v8  ;;  %2464 = vmatpush3.bf16.msra.mxu0 %v3344_v59 }
 0x590   :  { %2465 = vmatprep.subr.bf16.mxu0 %v3347_v37 }
 0x593   :  { %2466 = vmatpush3.bf16.msra.mxu0 %v3350_v47 }
 0x60a   :  { %v1687_v10 = vpop.xlane.xlu1 %1686  ;;  %v1685_v12 = vpop.xlane.xlu0 %1684 }
 0x60b   :  { %v1701_v14 = vmul.f32 0.0078125, %v1687_v10  ;;  %v1700_v3 = vmul.f32 0.0078125, %v1685_v12 }
 0x60d   :  { %v1709_v4 = vadd.f32 1e-05, %v1701_v14  ;;  %v1708_v15 = vadd.f32 1e-05, %v1700_v3 }
 0x60e   :  { %v1691_v32 = vpop.xlane.xlu1 %1690  ;;  %v1689_v31 = vpop.xlane.xlu0 %1688 }
 0x60f   :  { %2789 = vrsqrt.f32 %v1709_v4  ;;  %v1703_v16 = vmul.f32 0.0078125, %v1691_v32  ;;  %v1702_v17 = vmul.f32 0.0078125, %v1689_v31  ;;  %v2754_v32 = vld [vmem:[#allocation11 + $0x8] sm:$0xff]   ;;  %v1780_v31 = vld [vmem:[%s3479_s11] sm:$0x3] }
 0x610   :  { %2791 = vrsqrt.f32 %v1708_v15 }
 0x611   :  { %v1711_v35 = vadd.f32 1e-05, %v1703_v16  ;;  %v1710_v34 = vadd.f32 1e-05, %v1702_v17  ;;  %v1789_v17 = vrot.slane %v1780_v31, %v181_v40 }
 0x612   :  { %v1695_v13 = vpop.xlane.xlu1 %1694  ;;  %v1693_v21 = vpop.xlane.xlu0 %1692 }
 0x613   :  { %2793 = vrsqrt.f32 %v1711_v35  ;;  %v1705_v22 = vmul.f32 0.0078125, %v1695_v13  ;;  %v1704_v23 = vmul.f32 0.0078125, %v1693_v21  ;;  %v1785_v35 = vrot.slane %v1780_v31, %v3132_v43 }
 0x614   :  { %2795 = vrsqrt.f32 %v1710_v34 }
 0x615   :  { %v1713_v27 = vadd.f32 1e-05, %v1705_v22  ;;  %v1712_v28 = vadd.f32 1e-05, %v1704_v23 }
 0x616   :  { %v1699_v29 = vpop.xlane.xlu1 %1698  ;;  %v1697_v30 = vpop.xlane.xlu0 %1696 }
 0x617   :  { %2797 = vrsqrt.f32 %v1713_v27  ;;  %v1707_v33 = vmul.f32 0.0078125, %v1699_v29  ;;  %v1706_v36 = vmul.f32 0.0078125, %v1697_v30 }
 0x618   :  { %2799 = vrsqrt.f32 %v1712_v28 }
 0x619   :  { %v1715_v46 = vadd.f32 1e-05, %v1707_v33  ;;  %v1714_v49 = vadd.f32 1e-05, %v1706_v36 }
 0x61b   :  { %2801 = vrsqrt.f32 %v1715_v46 }
 0x61c   :  { %v2790_v48 = vpop.eup %2789  ;;  %2803 = vrsqrt.f32 %v1714_v49 }
 0x61d   :  { %v2792_v52 = vpop.eup %2791  ;;  %v1725_v53 = vmul.f32 %v2790_v48, %v3295_v19 }
 0x61e   :  { %v1724_v11 = vmul.f32 %v2792_v52, %v3297_v18 }
 0x61f   :  { %v1739_v60 = vmul.f32 %v2364_v51, %v1725_v53 }
 0x620   :  { %v2794_v61 = vpop.eup %2793  ;;  %v1738_v62 = vmul.f32 %v2364_v51, %v1724_v11 }
 0x621   :  { %v2796_v63 = vpop.eup %2795  ;;  %v3362_v1 = vadd.f32 %v2365_v58, %v1739_v60  ;;  %v1727_v54 = vmul.f32 %v2794_v61, %v3303_v24 }
 0x622   :  { %v3365_v25 = vadd.f32 %v2365_v58, %v1738_v62  ;;  %v1726_v19 = vmul.f32 %v2796_v63, %v3305_v26 }
 0x623   :  { %v1741_v18 = vmul.f32 %v2364_v51, %v1727_v54 }
 0x624   :  { %v2798_v5 = vpop.eup %2797  ;;  %v1760_v6 = vpack.c.bf16 %v3362_v1, %v3365_v25  ;;  %v1740_v7 = vmul.f32 %v2364_v51, %v1726_v19 }
 0x625   :  { %v2800_v42 = vpop.eup %2799  ;;  %v3374_v8 = vadd.f32 %v2365_v58, %v1741_v18  ;;  %v1729_v26 = vmul.f32 %v2798_v5, %v3311_v38 }
 0x626   :  { %1905 = vmatmul.mubr.bf16.vlgmr.msra.gmra.mxu1 %v1760_v6  ;;  %v3372_v20 = vadd.f32 %v2365_v58, %v1740_v7  ;;  %v1728_v24 = vmul.f32 %v2800_v42, %v3313_v45 }
 0x627   :  { %1914 = vmatprep.mubr.bf16.mxu1 %v2987_v0  ;;  %2649 = vmatpush3.bf16.msra.mxu1 %v3327_v44  ;;  %v1743_v3 = vmul.f32 %v2364_v51, %v1729_v26 }
 0x628   :  { %2642 = vmatprep.subr.bf16.mxu1 %v3329_v50  ;;  %v2802_v10 = vpop.eup %2801  ;;  %v1761_v12 = vpack.c.bf16 %v3374_v8, %v3372_v20  ;;  %v1742_v14 = vmul.f32 %v2364_v51, %v1728_v24 }
 0x629   :  { %v2804_v44 = vpop.eup %2803  ;;  %v3387_v38 = vadd.f32 %v2365_v58, %v1743_v3 }
 0x62a   :  { %v3385_v45 = vadd.f32 %v2365_v58, %v1742_v14  ;;  %v1730_v50 = vmul.f32 %v2804_v44, %v3321_v56 }
 0x62b   :  { %2650 = vmatpush3.bf16.msra.mxu1 %v3332_v2  ;;  %v1731_v2 = vmul.f32 %v2802_v10, %v3319_v55 }
 0x62c   :  { %2643 = vmatprep.subr.bf16.mxu1 %v3335_v57  ;;  %v1762_v57 = vpack.c.bf16 %v3387_v38, %v3385_v45  ;;  %v1744_v4 = vmul.f32 %v2364_v51, %v1730_v50 }
 0x62d   :  { %v1745_v15 = vmul.f32 %v2364_v51, %v1731_v2 }
 0x62e   :  { %1915 = vmatmul.mubr.bf16.gmra.mxu1 %v1761_v12 }
 0x62f   :  { %1924 = vmatprep.mubr.bf16.mxu1 %v2987_v0  ;;  %2651 = vmatpush3.bf16.msra.mxu1 %v3338_v41  ;;  %v3398_v41 = vadd.f32 %v2365_v58, %v1744_v4  ;;  %v3400_v56 = vadd.f32 %v2365_v58, %v1745_v15 }
 0x630   :  { %2644 = vmatprep.subr.bf16.mxu1 %v3341_v9  ;;  %v2751_v9 = vld [vmem:[#allocation11 + $0x50] sm:$0xff]  }
 0x631   :  { %v1763_v55 = vpack.c.bf16 %v3400_v56, %v3398_v41  ;;  %2467 = vmatprep.subr.bf16.mxu0 %v2751_v9 }
 0x633   :  { %2652 = vmatpush3.bf16.msra.mxu1 %v3344_v59  ;;  %v2752_v59 = vld [vmem:[#allocation11 + $0x10] sm:$0xff]  }
 0x634   :  { %2645 = vmatprep.subr.bf16.mxu1 %v3347_v37  ;;  %2468 = vmatpush3.bf16.msra.mxu0 %v2752_v59  ;;  %v2753_v37 = vld [vmem:[#allocation11 + $0x48] sm:$0xff]  }
 0x635   :  { %2469 = vmatprep.subr.bf16.mxu0 %v2753_v37 }
 0x636   :  { %1925 = vmatmul.mubr.bf16.gmra.mxu1 %v1762_v57 }
 0x637   :  { %1934 = vmatprep.mubr.bf16.mxu1 %v2987_v0  ;;  %2653 = vmatpush3.bf16.msra.mxu1 %v3350_v47  ;;  %v2755_v0 = vld [vmem:[#allocation11 + $0x40] sm:$0xff]  }
 0x638   :  { %2646 = vmatprep.subr.bf16.mxu1 %v2751_v9  ;;  %2470 = vmatpush3.bf16.msra.mxu0 %v2754_v32  ;;  %v2756_v47 = vld [vmem:[#allocation11] sm:$0xff]  }
 0x639   :  { %2471 = vmatprep.subr.bf16.mxu0 %v2755_v0 }
 0x63b   :  { %2654 = vmatpush3.bf16.msra.mxu1 %v2752_v59 }
 0x63c   :  { %2647 = vmatprep.subr.bf16.mxu1 %v2753_v37  ;;  %2472 = vmatpush3.bf16.msra.mxu0 %v2756_v47 }
 0x63e   :  { %1935 = vmatmul.mubr.bf16.gmra.mxu1 %v1763_v55 }
 0x63f   :  { %2655 = vmatpush3.bf16.msra.mxu1 %v2754_v32 }
 0x640   :  { %2648 = vmatprep.subr.bf16.mxu1 %v2755_v0 }
 0x643   :  { %2656 = vmatpush3.bf16.msra.mxu1 %v2756_v47 }
 0x6e6   :  { %v1906_v16 = vpop.f32.mrf.mxu1 }
 0x6e7   :  { %v1907_v23 = vadd.f32 %v1906_v16, %v1785_v35 }
 0x6e8   :  { %v1908_v34 = vpop.f32.mrf.mxu1 }
 0x6e9   :  { %v1909_v21 = vadd.f32 %v1908_v34, %v1789_v17  ;;  %v1945_v46 = vmax.f32 %v1907_v23, 0.0 }
 0x6ea   :  { %v1910_v13 = vpop.f32.mrf.mxu1 }
 0x6eb   :  { %v1911_v22 = vadd.f32 %v1910_v13, %v1785_v35  ;;  %v1946_v33 = vmax.f32 %v1909_v21, 0.0  ;;  %v2382_v21 = vld [vmem:[%s3481_s13] ss:$0 sm:$0xff] }
 0x6ec   :  { %v1912_v27 = vpop.f32.mrf.mxu1 }
 0x6ed   :  { %v1913_v28 = vadd.f32 %v1912_v27, %v1789_v17  ;;  %v1947_v29 = vmax.f32 %v1911_v22, 0.0 }
 0x6ee   :  { %v1916_v30 = vpop.f32.mrf.mxu1 }
 0x6ef   :  { %v1948_v36 = vmax.f32 %v1913_v28, 0.0  ;;  %v1961_v51 = vpack.c.bf16 %v1947_v29, %v1945_v46  ;;  %v1917_v43 = vadd.f32 %v1916_v30, %v1785_v35 }
 0x6f0   :  { %v1918_v48 = vpop.f32.mrf.mxu1 }
 0x6f1   :  { %v1962_v49 = vpack.c.bf16 %v1948_v36, %v1946_v33  ;;  %v1919_v39 = vadd.f32 %v1918_v48, %v1789_v17  ;;  %v1949_v63 = vmax.f32 %v1917_v43, 0.0 }
 0x6f2   :  { %v1920_v52 = vpop.f32.mrf.mxu1 }
 0x6f3   :  { %v1921_v40 = vadd.f32 %v1920_v52, %v1785_v35  ;;  %2136 = vmatprep.mubr.bf16.mxu0 %v1962_v49  ;;  %v1950_v61 = vmax.f32 %v1919_v39, 0.0 }
 0x6f4   :  { %v1922_v53 = vpop.f32.mrf.mxu1  ;;  %2137 = vmatmul.mubr.bf16.vlgmr.msra.gmra.mxu0 %v1961_v51 }
 0x6f5   :  { %v1923_v58 = vadd.f32 %v1922_v53, %v1789_v17  ;;  %v1951_v11 = vmax.f32 %v1921_v40, 0.0 }
 0x6f6   :  { %v1926_v60 = vpop.f32.mrf.mxu1 }
 0x6f7   :  { %v1952_v62 = vmax.f32 %v1923_v58, 0.0  ;;  %v1963_v5 = vpack.c.bf16 %v1951_v11, %v1949_v63  ;;  %v1927_v42 = vadd.f32 %v1926_v60, %v1785_v35 }
 0x6f8   :  { %v1928_v54 = vpop.f32.mrf.mxu1 }
 0x6f9   :  { %v1964_v19 = vpack.c.bf16 %v1952_v62, %v1950_v61  ;;  %v1929_v7 = vadd.f32 %v1928_v54, %v1789_v17  ;;  %v1953_v44 = vmax.f32 %v1927_v42, 0.0 }
 0x6fa   :  { %v1930_v6 = vpop.f32.mrf.mxu1 }
 0x6fb   :  { %v1931_v18 = vadd.f32 %v1930_v6, %v1785_v35  ;;  %2144 = vmatprep.mubr.bf16.mxu0 %v1964_v19  ;;  %v1954_v14 = vmax.f32 %v1929_v7, 0.0 }
 0x6fc   :  { %v1932_v24 = vpop.f32.mrf.mxu1  ;;  %2145 = vmatmul.mubr.bf16.gmra.mxu0 %v1963_v5 }
 0x6fd   :  { %v1933_v26 = vadd.f32 %v1932_v24, %v1789_v17  ;;  %v1955_v10 = vmax.f32 %v1931_v18, 0.0 }
 0x6fe   :  { %v1936_v12 = vpop.f32.mrf.mxu1 }
 0x6ff   :  { %v1956_v3 = vmax.f32 %v1933_v26, 0.0  ;;  %v1965_v57 = vpack.c.bf16 %v1955_v10, %v1953_v44  ;;  %v1937_v9 = vadd.f32 %v1936_v12, %v1785_v35 }
 0x700   :  { %v1938_v50 = vpop.f32.mrf.mxu1 }
 0x701   :  { %v1966_v2 = vpack.c.bf16 %v1956_v3, %v1954_v14  ;;  %v1939_v15 = vadd.f32 %v1938_v50, %v1789_v17  ;;  %v1957_v31 = vmax.f32 %v1937_v9, 0.0 }
 0x702   :  { %v1940_v4 = vpop.f32.mrf.mxu1 }
 0x703   :  { %v1941_v55 = vadd.f32 %v1940_v4, %v1785_v35  ;;  %2152 = vmatprep.mubr.bf16.mxu1 %v1966_v2  ;;  %v1958_v0 = vmax.f32 %v1939_v15, 0.0 }
 0x704   :  { %v1942_v59 = vpop.f32.mrf.mxu1  ;;  %2153 = vmatmul.mubr.bf16.vlgmr.msra.gmra.mxu1 %v1965_v57 }
 0x705   :  { %v1943_v37 = vadd.f32 %v1942_v59, %v1789_v17  ;;  %v1959_v32 = vmax.f32 %v1941_v55, 0.0 }
 0x707   :  { %v1960_v47 = vmax.f32 %v1943_v37, 0.0  ;;  %v1967_v34 = vpack.c.bf16 %v1959_v32, %v1957_v31 }
 0x709   :  { %v1968_v16 = vpack.c.bf16 %v1960_v47, %v1958_v0 }
 0x70b   :  { %2160 = vmatprep.mubr.bf16.mxu1 %v1968_v16 }
 0x70c   :  { %2161 = vmatmul.mubr.bf16.gmra.mxu1 %v1967_v34 }
 0x7b4   :  { %v2473_v13 = vpop.f32.mrf.mxu0 }
 0x7b6   :  { %v2474_v22 = vpop.f32.mrf.mxu0 }
 0x7b7   :  { %v2475_v23 = vadd.f32 %v2474_v22, %v2473_v13 }
 0x7b8   :  { %v2476_v27 = vpop.f32.mrf.mxu0 }
 0x7b9   :  { %v2139_v35 = vadd.f32 %v2475_v23, %v2382_v21 }
 0x7ba   :  { %v2477_v28 = vpop.f32.mrf.mxu0 }
 0x7bb   :  { %v2478_v29 = vadd.f32 %v2477_v28, %v2476_v27  ;;  %v2169_v17 = vadd.f32 %v2139_v35, %v3365_v25 }
 0x7bc   :  { %v2479_v30 = vpop.f32.mrf.mxu0 }
 0x7bd   :  { %v2142_v33 = vadd.f32 %v2478_v29, %v2382_v21  ;;  %2179 = vadd.xlane.f32.xlu0 %v2169_v17 }
 0x7be   :  { %v2480_v36 = vpop.f32.mrf.mxu0 }
 0x7bf   :  { %v2481_v46 = vadd.f32 %v2480_v36, %v2479_v30  ;;  %v2170_v48 = vadd.f32 %v2142_v33, %v3362_v1 }
 0x7c0   :  { %v2482_v49 = vpop.f32.mrf.mxu0 }
 0x7c1   :  { %v2147_v51 = vadd.f32 %v2481_v46, %v2382_v21  ;;  %2181 = vadd.xlane.f32.xlu1 %v2170_v48 }
 0x7c2   :  { %v2483_v52 = vpop.f32.mrf.mxu0 }
 0x7c3   :  { %v2484_v39 = vadd.f32 %v2483_v52, %v2482_v49  ;;  %v2171_v40 = vadd.f32 %v2147_v51, %v3372_v20 }
 0x7c4   :  { %v2485_v43 = vpop.f32.mrf.mxu1 }
 0x7c5   :  { %v2150_v53 = vadd.f32 %v2484_v39, %v2382_v21  ;;  %2183 = vadd.xlane.f32.xlu0 %v2171_v40 }
 0x7c6   :  { %v2486_v58 = vpop.f32.mrf.mxu1 }
 0x7c7   :  { %v2487_v11 = vadd.f32 %v2486_v58, %v2485_v43  ;;  %v2172_v25 = vadd.f32 %v2150_v53, %v3374_v8 }
 0x7c8   :  { %v2488_v60 = vpop.f32.mrf.mxu1 }
 0x7c9   :  { %v2155_v61 = vadd.f32 %v2487_v11, %v2382_v21  ;;  %2185 = vadd.xlane.f32.xlu1 %v2172_v25 }
 0x7ca   :  { %v2489_v62 = vpop.f32.mrf.mxu1 }
 0x7cb   :  { %v2490_v63 = vadd.f32 %v2489_v62, %v2488_v60  ;;  %v2173_v1 = vadd.f32 %v2155_v61, %v3385_v45  ;;  %v2399_v60 = vld [vmem:[%s3476_s8] ss:$0 sm:$0xff]  ;;  %s2993_s8 = smov [#allocation13]  }
 0x7cc   :  { %v2491_v54 = vpop.f32.mrf.mxu1 }
 0x7cd   :  { %v2158_v19 = vadd.f32 %v2490_v63, %v2382_v21  ;;  %2187 = vadd.xlane.f32.xlu0 %v2173_v1  ;;  %v2400_v63 = vld [vmem:[%s3477_s9] ss:$0 sm:$0xff]  ;;  %s2308_s9 = sshll.u32 %s2993_s8, 4  ;;  %s2309_s9 = int_to_ptr.vmem [resolvable:$true] %s2308_s9 }
 0x7ce   :  { %v2492_v5 = vpop.f32.mrf.mxu1  ;;  %s2945_s23 = scalar_lea.vmem %s2309_s9, 1024  ;;  %p2950_p3 = scmp.lt.s32.totalorder %s2309_s9, %s2309_s9 }
 0x7cf   :  { %v2493_v6 = vadd.f32 %v2492_v5, %v2491_v54  ;;  %v2174_v20 = vadd.f32 %v2158_v19, %v3387_v38  ;;  %p2946_p2 = scmp.ne.s32.totalorder %s2309_s9, %s2945_s23  ;;  %p2951_p4 = scmp.lt.s32.totalorder %s2945_s23, %s2945_s23 }
 0x7d0   :  { %v2494_v7 = vpop.f32.mrf.mxu1 }
 0x7d1   :  { %v2163_v18 = vadd.f32 %v2493_v6, %v2382_v21  ;;  %2189 = vadd.xlane.f32.xlu1 %v2174_v20  ;;  %p2952_p5 = por %p2951_p4, %p2950_p3 }
 0x7d2   :  { %v2495_v42 = vpop.f32.mrf.mxu1 }
 0x7d3   :  { %v2496_v24 = vadd.f32 %v2495_v42, %v2494_v7  ;;  %v2175_v8 = vadd.f32 %v2163_v18, %v3398_v41  ;;  %p2953_p6 = pnand %p2952_p5, %p2946_p2 }
 0x7d5   :  { %v2166_v26 = vadd.f32 %v2496_v24, %v2382_v21  ;;  %2191 = vadd.xlane.f32.xlu0 %v2175_v8 }
 0x7d7   :  { %v2176_v10 = vadd.f32 %v2166_v26, %v3400_v56 }
 0x7d9   :  { %2193 = vadd.xlane.f32.xlu1 %v2176_v10 }
 0x846   :  { %v2180_v45 = vpop.xlane.xlu0 %2179 }
 0x847   :  { %v2195_v12 = vmul.f32 0.0078125, %v2180_v45 }
 0x849   :  { %v2203_v14 = vsub.f32 %v2169_v17, %v2195_v12 }
 0x84a   :  { %v2182_v3 = vpop.xlane.xlu1 %2181 }
 0x84b   :  { %v2196_v44 = vmul.f32 0.0078125, %v2182_v3  ;;  %v2211_v50 = vmul.f32 %v2203_v14, %v2203_v14 }
 0x84d   :  { %v3421_v2 = vsub.f32 %v2170_v48, %v2196_v44  ;;  %2219 = vadd.xlane.f32.xlu0 %v2211_v50 }
 0x84e   :  { %v2184_v38 = vpop.xlane.xlu0 %2183 }
 0x84f   :  { %v2197_v57 = vmul.f32 0.0078125, %v2184_v38  ;;  %v2212_v4 = vmul.f32 %v3421_v2, %v3421_v2 }
 0x851   :  { %v3425_v41 = vsub.f32 %v2171_v40, %v2197_v57  ;;  %2221 = vadd.xlane.f32.xlu1 %v2212_v4 }
 0x852   :  { %v2186_v15 = vpop.xlane.xlu1 %2185 }
 0x853   :  { %v2198_v56 = vmul.f32 0.0078125, %v2186_v15  ;;  %v2213_v55 = vmul.f32 %v3425_v41, %v3425_v41 }
 0x855   :  { %v3429_v9 = vsub.f32 %v2172_v25, %v2198_v56  ;;  %2223 = vadd.xlane.f32.xlu0 %v2213_v55 }
 0x856   :  { %v2188_v59 = vpop.xlane.xlu0 %2187 }
 0x857   :  { %v2199_v37 = vmul.f32 0.0078125, %v2188_v59  ;;  %v2214_v32 = vmul.f32 %v3429_v9, %v3429_v9 }
 0x859   :  { %v3433_v0 = vsub.f32 %v2173_v1, %v2199_v37  ;;  %2225 = vadd.xlane.f32.xlu1 %v2214_v32 }
 0x85a   :  { %v2190_v47 = vpop.xlane.xlu1 %2189 }
 0x85b   :  { %v2200_v31 = vmul.f32 0.0078125, %v2190_v47  ;;  %v2215_v16 = vmul.f32 %v3433_v0, %v3433_v0 }
 0x85d   :  { %v3437_v34 = vsub.f32 %v2174_v20, %v2200_v31  ;;  %2227 = vadd.xlane.f32.xlu0 %v2215_v16 }
 0x85e   :  { %v2192_v13 = vpop.xlane.xlu0 %2191 }
 0x85f   :  { %v2201_v21 = vmul.f32 0.0078125, %v2192_v13  ;;  %v2216_v22 = vmul.f32 %v3437_v34, %v3437_v34 }
 0x861   :  { %v3441_v23 = vsub.f32 %v2175_v8, %v2201_v21  ;;  %2229 = vadd.xlane.f32.xlu1 %v2216_v22 }
 0x862   :  { %v2194_v27 = vpop.xlane.xlu1 %2193 }
 0x863   :  { %v2202_v35 = vmul.f32 0.0078125, %v2194_v27  ;;  %v2217_v28 = vmul.f32 %v3441_v23, %v3441_v23 }
 0x865   :  { %v3445_v29 = vsub.f32 %v2176_v10, %v2202_v35  ;;  %2231 = vadd.xlane.f32.xlu0 %v2217_v28 }
 0x867   :  { %v2218_v17 = vmul.f32 %v3445_v29, %v3445_v29 }
 0x869   :  { %2233 = vadd.xlane.f32.xlu1 %v2218_v17 }
 0x8d6   :  { %v2220_v30 = vpop.xlane.xlu0 %2219 }
 0x8d7   :  { %v2235_v33 = vmul.f32 0.0078125, %v2220_v30 }
 0x8d9   :  { %v2243_v36 = vadd.f32 1e-05, %v2235_v33 }
 0x8da   :  { %v2222_v46 = vpop.xlane.xlu1 %2221 }
 0x8db   :  { %2805 = vrsqrt.f32 %v2243_v36  ;;  %v2236_v48 = vmul.f32 0.0078125, %v2222_v46 }
 0x8dd   :  { %v2244_v49 = vadd.f32 1e-05, %v2236_v48 }
 0x8de   :  { %v2224_v51 = vpop.xlane.xlu0 %2223 }
 0x8df   :  { %2807 = vrsqrt.f32 %v2244_v49  ;;  %v2237_v52 = vmul.f32 0.0078125, %v2224_v51 }
 0x8e1   :  { %v2245_v39 = vadd.f32 1e-05, %v2237_v52 }
 0x8e2   :  { %v2226_v40 = vpop.xlane.xlu1 %2225 }
 0x8e3   :  { %2809 = vrsqrt.f32 %v2245_v39  ;;  %v2238_v43 = vmul.f32 0.0078125, %v2226_v40 }
 0x8e5   :  { %v2246_v53 = vadd.f32 1e-05, %v2238_v43 }
 0x8e6   :  { %v2228_v58 = vpop.xlane.xlu0 %2227 }
 0x8e7   :  { %2811 = vrsqrt.f32 %v2246_v53  ;;  %v2239_v11 = vmul.f32 0.0078125, %v2228_v58 }
 0x8e8   :  { %v2806_v25 = vpop.eup %2805 }
 0x8e9   :  { %v2259_v61 = vmul.f32 %v2806_v25, %v2203_v14  ;;  %v2247_v62 = vadd.f32 1e-05, %v2239_v11 }
 0x8ea   :  { %v2230_v1 = vpop.xlane.xlu1 %2229 }
 0x8eb   :  { %v2273_v54 = vmul.f32 %v2399_v60, %v2259_v61  ;;  %2813 = vrsqrt.f32 %v2247_v62  ;;  %v2240_v19 = vmul.f32 0.0078125, %v2230_v1 }
 0x8ec   :  { %v2808_v5 = vpop.eup %2807 }
 0x8ed   :  { %v2287_v6 = vadd.f32 %v2400_v63, %v2273_v54  ;;  %v2260_v20 = vmul.f32 %v2808_v5, %v3421_v2  ;;  %v2248_v7 = vadd.f32 1e-05, %v2240_v19 }
 0x8ee   :  { %v2232_v18 = vpop.xlane.xlu0 %2231 }
 0x8ef   :  { %2295 = vst [vmem:[#allocation13] sm:$0xff] %v2287_v6  ;;  %v2274_v42 = vmul.f32 %v2399_v60, %v2260_v20  ;;  %2815 = vrsqrt.f32 %v2248_v7  ;;  %v2241_v24 = vmul.f32 0.0078125, %v2232_v18 }
 0x8f0   :  { %v2810_v8 = vpop.eup %2809 }
 0x8f1   :  { %v2288_v26 = vadd.f32 %v2400_v63, %v2274_v42  ;;  %v2261_v10 = vmul.f32 %v2810_v8, %v3425_v41  ;;  %v2249_v45 = vadd.f32 1e-05, %v2241_v24 }
 0x8f2   :  { %v2234_v12 = vpop.xlane.xlu1 %2233 }
 0x8f3   :  { %2296 = vst [vmem:[#allocation13 + $0x8] sm:$0xff] %v2288_v26  ;;  %v2275_v14 = vmul.f32 %v2399_v60, %v2261_v10  ;;  %2817 = vrsqrt.f32 %v2249_v45  ;;  %v2242_v3 = vmul.f32 0.0078125, %v2234_v12 }
 0x8f4   :  { %v2812_v44 = vpop.eup %2811 }
 0x8f5   :  { %v2289_v50 = vadd.f32 %v2400_v63, %v2275_v14  ;;  %v2262_v2 = vmul.f32 %v2812_v44, %v3429_v9  ;;  %v2250_v38 = vadd.f32 1e-05, %v2242_v3 }
 0x8f7   :  { %2297 = vst [vmem:[#allocation13 + $0x10] sm:$0xff] %v2289_v50  ;;  %v2276_v57 = vmul.f32 %v2399_v60, %v2262_v2  ;;  %2819 = vrsqrt.f32 %v2250_v38 }
 0x8f8   :  { %v2814_v4 = vpop.eup %2813 }
 0x8f9   :  { %v2290_v15 = vadd.f32 %v2400_v63, %v2276_v57  ;;  %v2263_v56 = vmul.f32 %v2814_v4, %v3433_v0 }
 0x8fb   :  { %2298 = vst [vmem:[#allocation13 + $0x18] sm:$0xff] %v2290_v15  ;;  %v2277_v41 = vmul.f32 %v2399_v60, %v2263_v56 }
 0x8fc   :  { %v2816_v55 = vpop.eup %2815 }
 0x8fd   :  { %v2291_v59 = vadd.f32 %v2400_v63, %v2277_v41  ;;  %v2264_v37 = vmul.f32 %v2816_v55, %v3437_v34 }
 0x8ff   :  { %2299 = vst [vmem:[#allocation13 + $0x20] sm:$0xff] %v2291_v59  ;;  %v2278_v32 = vmul.f32 %v2399_v60, %v2264_v37 }
 0x900   :  { %v2818_v47 = vpop.eup %2817 }
 0x901   :  { %v2292_v31 = vadd.f32 %v2400_v63, %v2278_v32  ;;  %v2265_v9 = vmul.f32 %v2818_v47, %v3441_v23 }
 0x903   :  { %2300 = vst [vmem:[#allocation13 + $0x28] sm:$0xff] %v2292_v31  ;;  %v2279_v16 = vmul.f32 %v2399_v60, %v2265_v9 }
 0x904   :  { %v2820_v13 = vpop.eup %2819 }
 0x905   :  { %v2293_v21 = vadd.f32 %v2400_v63, %v2279_v16  ;;  %v2266_v22 = vmul.f32 %v2820_v13, %v3445_v29 }
 0x907   :  { %2301 = vst [vmem:[#allocation13 + $0x30] sm:$0xff] %v2293_v21  ;;  %v2280_v0 = vmul.f32 %v2399_v60, %v2266_v22 }
 0x909   :  { %v2294_v27 = vadd.f32 %v2400_v63, %v2280_v0 }
 0x90b   :  { %2302 = vst [vmem:[#allocation13 + $0x38] sm:$0xff] %v2294_v27 }
 0x90c   :  { %2956 = shalt.err (!%p2953_p6)
}
 0x90d   :  { %2314 = dma.vmem_to_hbm [thread:$0]  %s2309_s9, 1024, %s3482_s14, [#allocation4], %s2980_s27, %s2980_s27, %s2981_s28  }
 0x90e   :  { %2973 = dma.done.wait [#allocation4], 1024  }
 0x90f   :  { %2974 = vsyncadd [#allocation4], 4294966272 }
 0x910   :  { %2318 = vsyncpa [#allocation3], 1 }
 0x911   :  { %2319 = vsyncpa [#allocation6], 1 }
 0x912   :  { %2320 = vsyncpa [#allocation9], 1 }
 0x913   :  { %2321 = vsyncpa [#allocation12], 1 }
 0x914   :  { %2322 = vsyncpa [#allocation4], 1 }

</bundles_post_ra>
